<compile_context>
chip_gen: v7x
topology: tpu7x:2x2x1
jax: 0.10.0
libtpu: 0.0.40
codegen_flags: <defaults>
</compile_context>

<pallas_src>
import functools

import jax
import jax.numpy as jnp
from jax.experimental import pallas as pl
from jax.experimental.pallas import tpu as pltpu


# ----------------------------------------------------------------------------
# helpers
# ----------------------------------------------------------------------------

def _layer_norm(x, w, b, eps=1e-5):
    # Matches the fp32-compute LayerNorm subclass in the reference.
    xf = x.astype(jnp.float32)
    mu = jnp.mean(xf, axis=-1, keepdims=True)
    var = jnp.mean(jnp.square(xf - mu), axis=-1, keepdims=True)
    return (xf - mu) * jax.lax.rsqrt(var + eps) * w + b


def _pick_row_tile(S, target):
    """Largest multiple-of-8 divisor of S that is <= target (else full S)."""
    if S <= target:
        return S
    for t in range(target, 7, -1):
        if S % t == 0 and t % 8 == 0:
            return t
    return S


def _vmem_capacity():
    try:
        info = pltpu.get_tpu_info()
        cap = getattr(info, "vmem_capacity_bytes", None)
        if cap:
            return int(cap)
    except Exception:
        pass
    return 64 * 1024 * 1024  # conservative default (v7x per-TC VMEM)


_SB_SUPPORTED = None


def _single_buffer_supported():
    """Probe whether pipeline_mode=pl.Buffered(1) is supported on this jax."""
    global _SB_SUPPORTED
    if _SB_SUPPORTED is not None:
        return _SB_SUPPORTED
    try:
        spec = pl.BlockSpec((8, 128), lambda i: (0, 0),
                            pipeline_mode=pl.Buffered(1))

        def _copy(x_ref, o_ref):
            o_ref[...] = x_ref[...]

        fn = pl.pallas_call(
            _copy,
            out_shape=jax.ShapeDtypeStruct((8, 128), jnp.float32),
            grid_spec=pltpu.PrefetchScalarGridSpec(
                num_scalar_prefetch=0,
                grid=(2,),
                in_specs=[spec],
                out_specs=pl.BlockSpec((8, 128), lambda i: (0, 0)),
            ),
        )
        jax.block_until_ready(fn(jnp.ones((8, 128), jnp.float32)))
        _SB_SUPPORTED = True
    except Exception:
        _SB_SUPPORTED = False
    return _SB_SUPPORTED


def _const_spec(shape):
    """Grid-invariant (weight) input: single-buffered if supported."""
    idx = lambda b, i: (0, 0)
    if _single_buffer_supported():
        return pl.BlockSpec(shape, idx, pipeline_mode=pl.Buffered(1))
    return pl.BlockSpec(shape, idx)


# ----------------------------------------------------------------------------
# kernel 1: LN1 + fused QKV projection  (once per row)
# ----------------------------------------------------------------------------

def _qkv_kernel(scale, x_ref, ln1w_ref, ln1b_ref, wqkv_ref, bqkv_ref,
                q_ref, k_ref, v_ref):
    x = x_ref[0]                                   # (tr, C) f32
    C = x.shape[-1]
    xn = _layer_norm(x, ln1w_ref[0], ln1b_ref[0])  # f32
    qkv = jnp.dot(xn.astype(jnp.bfloat16), wqkv_ref[...],
                  preferred_element_type=jnp.float32) + bqkv_ref[0]
    q_ref[0] = (qkv[:, :C] * scale).astype(jnp.bfloat16)   # pre-scaled Q
    k_ref[0] = qkv[:, C:2 * C].astype(jnp.bfloat16)
    v_ref[0] = qkv[:, 2 * C:].astype(jnp.bfloat16)


def _qkv_projection(x, p, num_heads, row_block=256):
    B, S, C = x.shape
    tr = _pick_row_tile(S, row_block)
    scale = (C // num_heads) ** -0.5

    out_sds = jax.ShapeDtypeStruct((B, S, C), jnp.bfloat16)
    row_spec = pl.BlockSpec((1, tr, C), lambda b, i: (b, i, 0))
    return pl.pallas_call(
        functools.partial(_qkv_kernel, scale),
        out_shape=(out_sds, out_sds, out_sds),
        grid_spec=pltpu.PrefetchScalarGridSpec(
            num_scalar_prefetch=0,
            grid=(B, S // tr),
            in_specs=[
                row_spec,                       # x rows
                _const_spec((1, C)),            # ln1 weight
                _const_spec((1, C)),            # ln1 bias
                _const_spec((C, 3 * C)),        # fused QKV weight (bf16)
                _const_spec((1, 3 * C)),        # fused QKV bias (f32)
            ],
            out_specs=[row_spec, row_spec, row_spec],
        ),
        compiler_params=pltpu.CompilerParams(
            dimension_semantics=("parallel", "parallel")),
    )(x, p["ln1_w"], p["ln1_b"], p["wqkv"], p["bqkv"])


# ----------------------------------------------------------------------------
# kernel 2: attention (full-seq K/V) + output projection + MLP, per q tile
# ----------------------------------------------------------------------------

def _attn_mlp_kernel(num_heads,
                     x_ref, q_ref, k_ref, v_ref,
                     wo_ref, bo_ref,
                     ln2w_ref, ln2b_ref,
                     wfc_ref, bfc_ref, wpr_ref, bpr_ref,
                     o_ref, attn_scr):
    xq = x_ref[0]                       # (tq, C) f32 residual rows
    q = q_ref[0]                        # (tq, C) bf16, pre-scaled
    k = k_ref[0]                        # (S, C)  bf16
    v = v_ref[0]                        # (S, C)  bf16
    tq, C = xq.shape
    d = C // num_heads

    # ---------------- attention ----------------
    # Per-head attention; head outputs are written ("concatenated") into a
    # (tq, C) bf16 scratch, then projected with one full-depth Wo matmul.
    for h in range(num_heads):          # static unroll over heads
        sl = slice(h * d, (h + 1) * d)
        logits = jax.lax.dot_general(   # (tq, d) x (S, d) -> (tq, S)
            q[:, sl], k[:, sl], (((1,), (1,)), ((), ())),
            preferred_element_type=jnp.float32)
        logits = logits - jnp.max(logits, axis=-1, keepdims=True)
        p = jnp.exp(logits)
        p = p * pl.reciprocal(jnp.sum(p, axis=-1, keepdims=True), approx=True)
        oh = jnp.dot(p.astype(jnp.bfloat16), v[:, sl],
                     preferred_element_type=jnp.float32)        # (tq, d)
        attn_scr[:, sl] = oh.astype(jnp.bfloat16)

    attn = jnp.dot(attn_scr[...], wo_ref[...],
                   preferred_element_type=jnp.float32) + bo_ref[0]
    x1 = xq + attn                                              # residual 1

    # ---------------- MLP ----------------
    xn2 = _layer_norm(x1, ln2w_ref[0], ln2b_ref[0])
    h1 = jnp.dot(xn2.astype(jnp.bfloat16), wfc_ref[...],
                 preferred_element_type=jnp.float32) + bfc_ref[0]
    h1 = jax.nn.gelu(h1, approximate=False)      # exact erf GELU == nn.GELU()
    h2 = jnp.dot(h1.astype(jnp.bfloat16), wpr_ref[...],
                 preferred_element_type=jnp.float32) + bpr_ref[0]
    o_ref[0] = (x1 + h2).astype(o_ref.dtype)                    # residual 2


def _attn_mlp_vmem_bytes(S, tq, C, Hd):
    f32, bf16 = 4, 2
    # double-buffered pipelined streams (x tile, q tile, K, V, out tile)
    streams = 2 * (tq * C * f32 + tq * C * bf16 + 2 * S * C * bf16
                   + tq * C * f32)
    nbuf_w = 1 if _single_buffer_supported() else 2
    weights = nbuf_w * ((C * C + 2 * C * Hd) * bf16 + (4 * C + Hd) * f32)
    # live activations (f32 logits / probs, MLP hidden, misc) + bf16 scratch
    acts = (2 * tq * S + 2 * tq * Hd + 6 * tq * C) * f32 + tq * C * bf16
    est = int(1.5 * (streams + weights + acts))
    cap = _vmem_capacity()
    return min(max(est, 32 * 1024 * 1024), int(0.8 * cap))


def _attn_mlp(x, q, k, v, p, num_heads, q_block=None):
    B, S, C = x.shape
    if q_block is None:
        # larger q tiles on 128-MiB-VMEM parts (v5e/v6e), smaller on v7x
        q_block = 256 if _vmem_capacity() >= 96 * 1024 * 1024 else 128
    tq = _pick_row_tile(S, q_block)
    Hd = p["wfc"].shape[1]

    row_spec = pl.BlockSpec((1, tq, C), lambda b, qi: (b, qi, 0))
    seq_spec = pl.BlockSpec((1, S, C), lambda b, qi: (b, 0, 0))
    in_specs = [
        row_spec,                     # x residual rows (f32)
        row_spec,                     # q rows (bf16, pre-scaled)
        seq_spec,                     # K (bf16, full sequence)
        seq_spec,                     # V (bf16, full sequence)
        _const_spec((C, C)),          # wo (bf16)
        _const_spec((1, C)),          # bo
        _const_spec((1, C)),          # ln2 weight
        _const_spec((1, C)),          # ln2 bias
        _const_spec((C, Hd)),         # c_fc weight (bf16)
        _const_spec((1, Hd)),         # c_fc bias
        _const_spec((Hd, C)),         # c_proj weight (bf16)
        _const_spec((1, C)),          # c_proj bias
    ]
    return pl.pallas_call(
        functools.partial(_attn_mlp_kernel, num_heads),
        out_shape=jax.ShapeDtypeStruct((B, S, C), x.dtype),
        grid_spec=pltpu.PrefetchScalarGridSpec(
            num_scalar_prefetch=0,
            grid=(B, S // tq),
            in_specs=in_specs,
            out_specs=row_spec,
            scratch_shapes=[pltpu.VMEM((tq, C), jnp.bfloat16)],
        ),
        compiler_params=pltpu.CompilerParams(
            dimension_semantics=("parallel", "parallel"),
            vmem_limit_bytes=_attn_mlp_vmem_bytes(S, tq, C, Hd),
        ),
    )(x, q, k, v, p["wo"], p["bo"], p["ln2_w"], p["ln2_b"],
      p["wfc"], p["bfc"], p["wproj"], p["bproj"])


# ----------------------------------------------------------------------------
# block / transformer glue
# ----------------------------------------------------------------------------

def residual_attention_block(x, params, num_heads, q_block=None):
    """One ResidualAttentionBlock. x: (B, S, C) f32; params pre-prepared."""
    B, S, C = x.shape
    assert C % num_heads == 0, "embed_dim must be divisible by num_heads"
    assert C % 128 == 0, "embed_dim should be lane-aligned (multiple of 128)"
    q, k, v = _qkv_projection(x, params, num_heads)
    return _attn_mlp(x, q, k, v, params, num_heads, q_block)


def prepare_block_params(p):
    """One-time parameter preparation (NOT per forward pass): fuse the QKV
    weights into a single (C, 3C) matrix and cast the big matmul weights to
    bf16 (halves weight DMA + VMEM)."""
    wqkv = jnp.concatenate([p["wq"], p["wk"], p["wv"]], axis=1)
    bqkv = jnp.concatenate([p["bq"], p["bk"], p["bv"]], axis=1)
    return {
        "ln1_w": p["ln1_w"], "ln1_b": p["ln1_b"],
        "wqkv": wqkv.astype(jnp.bfloat16), "bqkv": bqkv,
        "wo": p["wo"].astype(jnp.bfloat16), "bo": p["bo"],
        "ln2_w": p["ln2_w"], "ln2_b": p["ln2_b"],
        "wfc": p["wfc"].astype(jnp.bfloat16), "bfc": p["bfc"],
        "wproj": p["wproj"].astype(jnp.bfloat16), "bproj": p["bproj"],
    }


def prepare_transformer_params(blocks_params):
    return [prepare_block_params(p) for p in blocks_params]


def transformer_forward(x_nhwc, prepared_blocks, num_heads, return_layer=(-1,)):
    """Matches Transformer.forward: returns (x, x_list) with NHWC tensors.
    `prepared_blocks` must come from prepare_transformer_params (called once)."""
    B, H, W, C = x_nhwc.shape
    x = x_nhwc.reshape(B, H * W, C)
    depth = len(prepared_blocks)
    x_list = []
    for idx, p in enumerate(prepared_blocks):
        x = residual_attention_block(x, p, num_heads)
        if idx in return_layer or idx == depth - 1:
            x_list.append(x.reshape(B, H, W, C))
    return x.reshape(B, H, W, C), x_list


# ----------------------------------------------------------------------------
# synthetic params + pure-JAX reference (for a loose correctness check)
# ----------------------------------------------------------------------------

def init_block_params(key, embed_dim, mlp_ratio=4.0):
    """Deterministic synthetic params. Linear weights are stored pre-transposed
    to (in_features, out_features) so the kernels compute x @ W directly."""
    C = embed_dim
    Hd = int(C * mlp_ratio)
    ks = jax.random.split(key, 8)
    s = 0.02
    f32 = jnp.float32
    return {
        "ln1_w": jnp.ones((1, C), f32),
        "ln1_b": jnp.zeros((1, C), f32),
        "wq": s * jax.random.normal(ks[0], (C, C), f32),   # in_proj_weight[:C].T
        "wk": s * jax.random.normal(ks[1], (C, C), f32),   # in_proj_weight[C:2C].T
        "wv": s * jax.random.normal(ks[2], (C, C), f32),   # in_proj_weight[2C:].T
        "bq": s * jax.random.normal(ks[3], (1, C), f32),
        "bk": s * jax.random.normal(ks[4], (1, C), f32),
        "bv": s * jax.random.normal(ks[5], (1, C), f32),
        "wo": s * jax.random.normal(ks[6], (C, C), f32),   # out_proj.weight.T
        "bo": jnp.zeros((1, C), f32),
        "ln2_w": jnp.ones((1, C), f32),
        "ln2_b": jnp.zeros((1, C), f32),
        "wfc": s * jax.random.normal(ks[7], (C, Hd), f32),                       # c_fc.weight.T
        "bfc": s * jax.random.normal(jax.random.fold_in(key, 99), (1, Hd), f32),
        "wproj": s * jax.random.normal(jax.random.fold_in(key, 100), (Hd, C), f32),  # c_proj.weight.T
        "bproj": jnp.zeros((1, C), f32),
    }


def _reference_block(x, p, num_heads):
    """Pure-JAX f32 reference of one ResidualAttentionBlock (eval mode)."""
    def ln(y, w, b, eps=1e-5):
        mu = y.mean(-1, keepdims=True)
        var = ((y - mu) ** 2).mean(-1, keepdims=True)
        return (y - mu) / jnp.sqrt(var + eps) * w + b

    B, S, C = x.shape
    d = C // num_heads
    xn = ln(x, p["ln1_w"][0], p["ln1_b"][0])
    q = xn @ p["wq"] + p["bq"][0]
    k = xn @ p["wk"] + p["bk"][0]
    v = xn @ p["wv"] + p["bv"][0]
    q = q.reshape(B, S, num_heads, d).transpose(0, 2, 1, 3)
    k = k.reshape(B, S, num_heads, d).transpose(0, 2, 1, 3)
    v = v.reshape(B, S, num_heads, d).transpose(0, 2, 1, 3)
    attn = jax.nn.softmax((q * d ** -0.5) @ jnp.swapaxes(k, -1, -2), axis=-1)
    o = (attn @ v).transpose(0, 2, 1, 3).reshape(B, S, C)
    x1 = x + o @ p["wo"] + p["bo"][0]
    xn2 = ln(x1, p["ln2_w"][0], p["ln2_b"][0])
    h = jax.nn.gelu(xn2 @ p["wfc"] + p["bfc"][0], approximate=False)
    return x1 + h @ p["wproj"] + p["bproj"][0]


# ----------------------------------------------------------------------------

if __name__ == "__main__":
    key = jax.random.PRNGKey(0)
    # Small but lane-aligned shapes: NHWC, S = H*W = 256, C = 128 (d = 32).
    B, H, W, C = 2, 16, 16, 128
    depth, num_heads = 2, 4

    kx, kp = jax.random.split(key)
    x = jax.random.normal(kx, (B, H, W, C), jnp.float32)
    raw_blocks = [init_block_params(jax.random.fold_in(kp, i), C)
                  for i in range(depth)]
    blocks = prepare_transformer_params(raw_blocks)   # one-time bf16 cast

    out, out_list = transformer_forward(x, blocks, num_heads)
    jax.block_until_ready(out)
    jax.block_until_ready(out_list)

    # pure-JAX f32 reference (loose tolerance: bf16 matmuls + approx recip)
    xr = x.reshape(B, H * W, C)
    for p in raw_blocks:
        xr = _reference_block(xr, p, num_heads)
    xr = xr.reshape(B, H, W, C)
    max_err = float(jnp.max(jnp.abs(out - xr)))

    assert out.shape == (B, H, W, C)
    assert len(out_list) == 1 and out_list[0].shape == (B, H, W, C)
    assert bool(jnp.all(jnp.isfinite(out)))
    assert max_err < 5e-2, f"max abs err vs reference: {max_err}"
    print("KERNEL_OK")
</pallas_src>

<mosaic_0001>
module attributes {stable_mosaic.version = 11 : i64} {
  func.func @_copy(%arg0: i32, %arg1: memref<8x128xf32, #tpu.memory_space<vmem>>, %arg2: memref<8x128xf32, #tpu.memory_space<vmem>>) attributes {dimension_semantics = [#tpu.dimension_semantics<arbitrary>], iteration_bounds = array<i64: 2>, scalar_prefetch = 0 : i64, scratch_operands = 0 : i64, tpu.core_type = #tpu.core_type<tc>, window_params = [{pipeline_mode = #tpu.pipeline_mode<synchronous>, transform_indices = @transform_0, window_bounds = array<i64: 8, 128>}, {pipeline_mode = #tpu.pipeline_mode<synchronous>, transform_indices = @transform_1, window_bounds = array<i64: 8, 128>}]} {
    %c0 = arith.constant 0 : index
    %c0_0 = arith.constant 0 : index
    %0 = vector.load %arg1[%c0, %c0_0] : memref<8x128xf32, #tpu.memory_space<vmem>>, vector<8x128xf32>
    %c0_1 = arith.constant 0 : index
    %c0_2 = arith.constant 0 : index
    %1 = vector.load %arg2[%c0_1, %c0_2] : memref<8x128xf32, #tpu.memory_space<vmem>>, vector<8x128xf32>
    tpu.vector_store %arg2[%c0_1, %c0_2], %0 {strides = array<i32>} : memref<8x128xf32, #tpu.memory_space<vmem>>, vector<8x128xf32>,
    return
  }
  func.func @transform_0(%arg0: i32) -> (i32, i32) {
    %c0_i32 = arith.constant 0 : i32
    %c0_i32_0 = arith.constant 0 : i32
    %c0_i32_1 = arith.constant 0 : i32
    return %c0_i32, %c0_i32_0 : i32, i32
  }
  func.func @transform_1(%arg0: i32) -> (i32, i32) {
    %c0_i32 = arith.constant 0 : i32
    %c0_i32_0 = arith.constant 0 : i32
    %c0_i32_1 = arith.constant 0 : i32
    return %c0_i32, %c0_i32_0 : i32, i32
  }
}

module attributes {stable_mosaic.version = 11 : i64} {
  func.func @_qkv_kernel(%arg0: i32, %arg1: i32, %arg2: memref<1x256x128xf32, #tpu.memory_space<vmem>>, %arg3: memref<1x128xf32, #tpu.memory_space<vmem>>, %arg4: memref<1x128xf32, #tpu.memory_space<vmem>>, %arg5: memref<128x384xbf16, #tpu.memory_space<vmem>>, %arg6: memref<1x384xf32, #tpu.memory_space<vmem>>, %arg7: memref<1x256x128xbf16, #tpu.memory_space<vmem>>, %arg8: memref<1x256x128xbf16, #tpu.memory_space<vmem>>, %arg9: memref<1x256x128xbf16, #tpu.memory_space<vmem>>) attributes {dimension_semantics = [#tpu.dimension_semantics<parallel>, #tpu.dimension_semantics<parallel>], iteration_bounds = array<i64: 2, 1>, scalar_prefetch = 0 : i64, scratch_operands = 0 : i64, tpu.core_type = #tpu.core_type<tc>, window_params = [{transform_indices = @transform_0, window_bounds = array<i64: 1, 256, 128>}, {pipeline_mode = #tpu.pipeline_mode<synchronous>, transform_indices = @transform_1, window_bounds = array<i64: 1, 128>}, {pipeline_mode = #tpu.pipeline_mode<synchronous>, transform_indices = @transform_2, window_bounds = array<i64: 1, 128>}, {pipeline_mode = #tpu.pipeline_mode<synchronous>, transform_indices = @transform_3, window_bounds = array<i64: 128, 384>}, {pipeline_mode = #tpu.pipeline_mode<synchronous>, transform_indices = @transform_4, window_bounds = array<i64: 1, 384>}, {transform_indices = @transform_5, window_bounds = array<i64: 1, 256, 128>}, {transform_indices = @transform_6, window_bounds = array<i64: 1, 256, 128>}, {transform_indices = @transform_7, window_bounds = array<i64: 1, 256, 128>}]} {
    %c0 = arith.constant 0 : index
    %c0_0 = arith.constant 0 : index
    %c0_1 = arith.constant 0 : index
    %0 = vector.load %arg2[%c0, %c0_0, %c0_1] : memref<1x256x128xf32, #tpu.memory_space<vmem>>, vector<1x256x128xf32>
    %1 = vector.shape_cast %0 : vector<1x256x128xf32> to vector<256x128xf32>
    %c0_2 = arith.constant 0 : index
    %c0_3 = arith.constant 0 : index
    %2 = vector.load %arg3[%c0_2, %c0_3] : memref<1x128xf32, #tpu.memory_space<vmem>>, vector<1x128xf32>
    %3 = vector.shape_cast %2 : vector<1x128xf32> to vector<128xf32>
    %c0_4 = arith.constant 0 : index
    %c0_5 = arith.constant 0 : index
    %4 = vector.load %arg4[%c0_4, %c0_5] : memref<1x128xf32, #tpu.memory_space<vmem>>, vector<1x128xf32>
    %5 = vector.shape_cast %4 : vector<1x128xf32> to vector<128xf32>
    %cst = arith.constant dense<0.000000e+00> : vector<256xf32>
    %6 = vector.multi_reduction <add>, %1, %cst [1] : vector<256x128xf32> to vector<256xf32>
    %7 = vector.shape_cast %6 : vector<256xf32> to vector<256x1xf32>
    %cst_6 = arith.constant 1.280000e+02 : f32
    %8 = vector.broadcast %cst_6 : f32 to vector<256x1xf32>
    %9 = arith.divf %7, %8 : vector<256x1xf32>
    %10 = vector.broadcast %9 : vector<256x1xf32> to vector<256x128xf32>
    %11 = arith.subf %1, %10 : vector<256x128xf32>
    %12 = arith.mulf %11, %11 : vector<256x128xf32>
    %cst_7 = arith.constant dense<0.000000e+00> : vector<256xf32>
    %13 = vector.multi_reduction <add>, %12, %cst_7 [1] : vector<256x128xf32> to vector<256xf32>
    %14 = vector.shape_cast %13 : vector<256xf32> to vector<256x1xf32>
    %cst_8 = arith.constant 1.280000e+02 : f32
    %15 = vector.broadcast %cst_8 : f32 to vector<256x1xf32>
    %16 = arith.divf %14, %15 : vector<256x1xf32>
    %17 = vector.broadcast %9 : vector<256x1xf32> to vector<256x128xf32>
    %18 = arith.subf %1, %17 : vector<256x128xf32>
    %cst_9 = arith.constant 9.99999974E-6 : f32
    %19 = vector.broadcast %cst_9 : f32 to vector<256x1xf32>
    %20 = arith.addf %16, %19 : vector<256x1xf32>
    %21 = math.rsqrt %20 : vector<256x1xf32>
    %22 = vector.broadcast %21 : vector<256x1xf32> to vector<256x128xf32>
    %23 = arith.mulf %18, %22 : vector<256x128xf32>
    %24 = vector.shape_cast %3 : vector<128xf32> to vector<1x128xf32>
    %25 = vector.broadcast %24 : vector<1x128xf32> to vector<256x128xf32>
    %26 = arith.mulf %23, %25 : vector<256x128xf32>
    %27 = vector.shape_cast %5 : vector<128xf32> to vector<1x128xf32>
    %28 = vector.broadcast %27 : vector<1x128xf32> to vector<256x128xf32>
    %29 = arith.addf %26, %28 : vector<256x128xf32>
    %30 = arith.truncf %29 : vector<256x128xf32> to vector<256x128xbf16>
    %c0_10 = arith.constant 0 : index
    %c0_11 = arith.constant 0 : index
    %31 = vector.load %arg5[%c0_10, %c0_11] : memref<128x384xbf16, #tpu.memory_space<vmem>>, vector<128x384xbf16>
    %cst_12 = arith.constant dense<0.000000e+00> : vector<256x384xf32>
    %32 = tpu.matmul %30, %31, %cst_12 {dimension_numbers = #tpu.dot_dimension_numbers<[1], [0], [0], [1], [0, 0, 1, 1], [], []>} : vector<256x128xbf16>, vector<128x384xbf16>, vector<256x384xf32> -> vector<256x384xf32>
    %c0_13 = arith.constant 0 : index
    %c0_14 = arith.constant 0 : index
    %33 = vector.load %arg6[%c0_13, %c0_14] : memref<1x384xf32, #tpu.memory_space<vmem>>, vector<1x384xf32>
    %34 = vector.shape_cast %33 : vector<1x384xf32> to vector<384xf32>
    %35 = vector.shape_cast %34 : vector<384xf32> to vector<1x384xf32>
    %36 = vector.broadcast %35 : vector<1x384xf32> to vector<256x384xf32>
    %37 = arith.addf %32, %36 : vector<256x384xf32>
    %38 = vector.extract_strided_slice %37 {offsets = [0, 0], sizes = [256, 128], strides = [1, 1]} : vector<256x384xf32> to vector<256x128xf32>
    %cst_15 = arith.constant 0.176776692 : f32
    %39 = vector.broadcast %cst_15 : f32 to vector<256x128xf32>
    %40 = arith.mulf %38, %39 : vector<256x128xf32>
    %41 = arith.truncf %40 : vector<256x128xf32> to vector<256x128xbf16>
    %c0_16 = arith.constant 0 : index
    %c0_17 = arith.constant 0 : index
    %c0_18 = arith.constant 0 : index
    %42 = vector.load %arg7[%c0_16, %c0_17, %c0_18] : memref<1x256x128xbf16, #tpu.memory_space<vmem>>, vector<1x256x128xbf16>
    %43 = vector.shape_cast %42 : vector<1x256x128xbf16> to vector<256x128xbf16>
    %44 = vector.shape_cast %41 : vector<256x128xbf16> to vector<1x256x128xbf16>
    tpu.vector_store %arg7[%c0_16, %c0_17, %c0_18], %44 {strides = array<i32>} : memref<1x256x128xbf16, #tpu.memory_space<vmem>>, vector<1x256x128xbf16>,
    %45 = vector.extract_strided_slice %37 {offsets = [0, 128], sizes = [256, 128], strides = [1, 1]} : vector<256x384xf32> to vector<256x128xf32>
    %46 = arith.truncf %45 : vector<256x128xf32> to vector<256x128xbf16>
    %c0_19 = arith.constant 0 : index
    %c0_20 = arith.constant 0 : index
    %c0_21 = arith.constant 0 : index
    %47 = vector.load %arg8[%c0_19, %c0_20, %c0_21] : memref<1x256x128xbf16, #tpu.memory_space<vmem>>, vector<1x256x128xbf16>
    %48 = vector.shape_cast %47 : vector<1x256x128xbf16> to vector<256x128xbf16>
    %49 = vector.shape_cast %46 : vector<256x128xbf16> to vector<1x256x128xbf16>
    tpu.vector_store %arg8[%c0_19, %c0_20, %c0_21], %49 {strides = array<i32>} : memref<1x256x128xbf16, #tpu.memory_space<vmem>>, vector<1x256x128xbf16>,
    %50 = vector.extract_strided_slice %37 {offsets = [0, 256], sizes = [256, 128], strides = [1, 1]} : vector<256x384xf32> to vector<256x128xf32>
    %51 = arith.truncf %50 : vector<256x128xf32> to vector<256x128xbf16>
    %c0_22 = arith.constant 0 : index
    %c0_23 = arith.constant 0 : index
    %c0_24 = arith.constant 0 : index
    %52 = vector.load %arg9[%c0_22, %c0_23, %c0_24] : memref<1x256x128xbf16, #tpu.memory_space<vmem>>, vector<1x256x128xbf16>
    %53 = vector.shape_cast %52 : vector<1x256x128xbf16> to vector<256x128xbf16>
    %54 = vector.shape_cast %51 : vector<256x128xbf16> to vector<1x256x128xbf16>
    tpu.vector_store %arg9[%c0_22, %c0_23, %c0_24], %54 {strides = array<i32>} : memref<1x256x128xbf16, #tpu.memory_space<vmem>>, vector<1x256x128xbf16>,
    return
  }
  func.func @transform_0(%arg0: i32, %arg1: i32) -> (i32, i32, i32) {
    %c0_i32 = arith.constant 0 : i32
    %c0_i32_0 = arith.constant 0 : i32
    return %arg0, %arg1, %c0_i32 : i32, i32, i32
  }
  func.func @transform_1(%arg0: i32, %arg1: i32) -> (i32, i32) {
    %c0_i32 = arith.constant 0 : i32
    %c0_i32_0 = arith.constant 0 : i32
    %c0_i32_1 = arith.constant 0 : i32
    return %c0_i32, %c0_i32_0 : i32, i32
  }
  func.func @transform_2(%arg0: i32, %arg1: i32) -> (i32, i32) {
    %c0_i32 = arith.constant 0 : i32
    %c0_i32_0 = arith.constant 0 : i32
    %c0_i32_1 = arith.constant 0 : i32
    return %c0_i32, %c0_i32_0 : i32, i32
  }
  func.func @transform_3(%arg0: i32, %arg1: i32) -> (i32, i32) {
    %c0_i32 = arith.constant 0 : i32
    %c0_i32_0 = arith.constant 0 : i32
    %c0_i32_1 = arith.constant 0 : i32
    return %c0_i32, %c0_i32_0 : i32, i32
  }
  func.func @transform_4(%arg0: i32, %arg1: i32) -> (i32, i32) {
    %c0_i32 = arith.constant 0 : i32
    %c0_i32_0 = arith.constant 0 : i32
    %c0_i32_1 = arith.constant 0 : i32
    return %c0_i32, %c0_i32_0 : i32, i32
  }
  func.func @transform_5(%arg0: i32, %arg1: i32) -> (i32, i32, i32) {
    %c0_i32 = arith.constant 0 : i32
    %c0_i32_0 = arith.constant 0 : i32
    return %arg0, %arg1, %c0_i32 : i32, i32, i32
  }
  func.func @transform_6(%arg0: i32, %arg1: i32) -> (i32, i32, i32) {
    %c0_i32 = arith.constant 0 : i32
    %c0_i32_0 = arith.constant 0 : i32
    return %arg0, %arg1, %c0_i32 : i32, i32, i32
  }
  func.func @transform_7(%arg0: i32, %arg1: i32) -> (i32, i32, i32) {
    %c0_i32 = arith.constant 0 : i32
    %c0_i32_0 = arith.constant 0 : i32
    return %arg0, %arg1, %c0_i32 : i32, i32, i32
  }
}

</mosaic_0001>

<bundles_post_ra>
// kernel: tpu_custom_call.1
= control target key start
LH: loop header
LB: loop body
LE: loop exit
PB: predicated region body
PF: predicated region fallthrough
CT: control target
= control target key end

     0   :  { %6 = vsyncpa [#allocation3], 0  ;;  %s340_s0 = inlined_call_operand.hbm [shape: f32[8,128], index: 0, kind: input, shape index: {}]   ;;  %s341_s1 = inlined_call_operand.hbm [shape: f32[8,128], index: 1, kind: output, shape index: {}]  }
   0x1   :  { %7 = vsyncpa [#allocation4], 0  ;;  %s261_s6 = smov 0  }
   0x2 LB: > { %s144_s7 = sadd.s32 4294967295, %s247_s6   ;;  %p145_p0 = scmp.ge.s32.totalorder %s247_s6, 1  ;;  %s247_s6 = sphi %s261_s6, %s13_s6  }
   0x3   : > { %p60_p1 = scmp.lt.s32.totalorder %s247_s6, 3  ;;  %p275_p3 = scmp.eq.s32.totalorder %s144_s7, 0 }
   0x4   : > { %s249_s10 = smov [#allocation2]   ;;  %s179_s15 = scalar_lea.hbm %s340_s0, 128 }
   0x5   : > { %p269_p2 = pnand %p145_p0, %p60_p1  ;;  %s73_s11 = sshll.u32 %s249_s10, 4  ;;  %s74_s11 = int_to_ptr.vmem [resolvable:$true] %s73_s11 }
   0x6   : > { %s346_s9 = scalar_select %p275_p3, 1, 0 }
   0x7   : > { %s345_s8 = scalar_select %p269_p2, 1, 0 }
   0x8   : > { %p161_p4 = pneg %p269_p2  ;;  %p180_p6 = scmp.ne.s32.totalorder %s340_s0, %s179_s15 }
   0x9   : > { %p186_p10 = scmp.lt.u32.totalorder %s179_s15, %s340_s0 }
   0xa   : > { %p283_p5 = pnand %p275_p3, %p161_p4 }
   0xc   : > { %p181_p7 = pneg %p283_p5 }
   0xe   : > { %p182_p8 = pnand %p181_p7, %p180_p6 }
  0x10   : > { %p183_p9 = pneg %p182_p8 }
  0x12   : > { %p188_p11 = pnand %p186_p10, %p183_p9 }
  0x14   : > { %191 = shalt.err (!%p188_p11)
}
  0x15   : > { %s192_s20 = scalar_lea.vmem %s74_s11, 128  ;;  %p200_p1 = scmp.lt.s32.totalorder %s74_s11, %s74_s11 }
  0x16   : > { %p193_p12 = scmp.ne.s32.totalorder %s74_s11, %s192_s20  ;;  %p201_p4 = scmp.lt.s32.totalorder %s192_s20, %s192_s20 }
  0x18   : > { %p195_p13 = pnand %p193_p12, %p181_p7  ;;  %p202_p3 = por %p201_p4, %p200_p1 }
  0x1a   : > { %p196_p0 = pneg %p195_p13 }
  0x1c   : > { %p203_p2 = pnand %p202_p3, %p196_p0 }
  0x1e   : > { %206 = shalt.err (!%p203_p2)
}
  0x1f   : > { %164 = dma.hbm_to_vmem [thread:$0]  (!%p283_p5), %s340_s0, 128, %s74_s11, [#allocation3]  }
  0x20   : > { %p348_p6 = scmp.ne.s32.totalorder %s345_s8, 0 }
  0x21   : > { %p349_p8 = scmp.ne.s32.totalorder (!%p348_p6), %s346_s9, 0 }
  0x22   : > { %86 = sbr.rel (%p348_p6) target bundleno = 67 (0x43), region = 24 }
  0x29   : > { %238 = dma.done.wait (%p349_p8), [#allocation3], 128  }
  0x2a   : > { %240 = vsyncadd (%p349_p8), [#allocation3], 4294967168  ;;  %s250_s23 = smov [#allocation5]   ;;  %p311_p2 = scmp.eq.s32.totalorder %s144_s7, 1  ;;  %v96_v0 = vld [vmem:[#allocation2] sm:$0xff] }
  0x2b   : > { %s105_s24 = sshll.u32 %s250_s23, 4  ;;  %97 = vst [vmem:[#allocation5] sm:$0xff] %v96_v0  ;;  %s106_s24 = int_to_ptr.vmem [resolvable:$true] %s105_s24 }
  0x2c   : > { %s207_s26 = scalar_lea.vmem %s106_s24, 128  ;;  %p214_p9 = scmp.lt.s32.totalorder %s106_s24, %s106_s24 }
  0x2d   : > { %p208_p3 = scmp.ne.s32.totalorder %s106_s24, %s207_s26  ;;  %p215_p10 = scmp.lt.s32.totalorder %s207_s26, %s207_s26 }
  0x2f   : > { %p209_p5 = pnand %p208_p3, %p311_p2  ;;  %p216_p11 = por %p215_p10, %p214_p9 }
  0x31   : > { %p210_p7 = pneg %p209_p5 }
  0x33   : > { %p217_p12 = pnand %p216_p11, %p210_p7 }
  0x35   : > { %220 = shalt.err (!%p217_p12)
}
  0x36   : > { %s221_s29 = scalar_lea.hbm %s341_s1, 128 }
  0x37   : > { %p222_p13 = scmp.ne.s32.totalorder %s341_s1, %s221_s29  ;;  %p227_p4 = scmp.lt.u32.totalorder %s221_s29, %s341_s1 }
  0x39   : > { %p223_p0 = pnand %p222_p13, %p311_p2 }
  0x3b   : > { %p224_p1 = pneg %p223_p0 }
  0x3d   : > { %p229_p6 = pnand %p227_p4, %p224_p1 }
  0x3f   : > { %232 = shalt.err (!%p229_p6)
}
  0x40   : > { %158 = dma.vmem_to_hbm [thread:$0]  (%p311_p2), %s106_s24, 128, %s341_s1, [#allocation4]  }
  0x41   : > { %242 = dma.done.wait (%p311_p2), [#allocation4], 128  }
  0x42   : > { %244 = vsyncadd (%p311_p2), [#allocation4], 4294967168 }
  0x43 PF: > { %s13_s6 = sadd.s32 1, %s247_s6  }
  0x44   : > { %p10_p8 = scmp.ge.s32.totalorder %s13_s6, 4  }
  0x46   :  { %12 = sbr.rel (!%p10_p8) target bundleno = 2 (0x2), region = 53 }
  0x4d   :  { %118 = vsyncpa [#allocation3], 1 }
  0x4e   :  { %120 = vsyncpa [#allocation3 + $0x1], 1 }
  0x4f   :  { %121 = vsyncpa [#allocation4], 1 }
  0x50   :  { %123 = vsyncpa [#allocation4 + $0x1], 1 }

// kernel: tpu_custom_call.1
= control target key start
LH: loop header
LB: loop body
LE: loop exit
PB: predicated region body
PF: predicated region fallthrough
CT: control target
= control target key end

     0   :  { %s4098_s0 = inlined_call_operand.hbm [shape: f32[2,256,128], index: 0, kind: input, shape index: {}]   ;;  %s4099_s1 = inlined_call_operand.vmem [shape: f32[1,128], index: 1, kind: input, shape index: {}]   ;;  %s4100_s2 = inlined_call_operand.vmem [shape: f32[1,128], index: 2, kind: input, shape index: {}]   ;;  %s4101_s3 = inlined_call_operand.hbm [shape: bf16[128,384], index: 3, kind: input, shape index: {}]   ;;  %s4102_s4 = inlined_call_operand.vmem [shape: f32[1,384], index: 4, kind: input, shape index: {}]   ;;  %s4103_s5 = inlined_call_operand.hbm [shape: bf16[2,256,128], index: 5, kind: output, shape index: {0}]   ;;  %s4104_s6 = inlined_call_operand.hbm [shape: bf16[2,256,128], index: 6, kind: output, shape index: {1}]   ;;  %s4105_s7 = inlined_call_operand.hbm [shape: bf16[2,256,128], index: 7, kind: output, shape index: {2}]  }
   0x1   :  { %4110 = sst [smem:[#allocation15_spill]] %s4098_s0 }
   0x2   :  { %4111 = sst [smem:[#allocation16_spill]] %s4099_s1 }
   0x3   :  { %4112 = sst [smem:[#allocation17_spill]] %s4100_s2 }
   0x4   :  { %4113 = sst [smem:[#allocation18_spill]] %s4101_s3 }
   0x5   :  { %13 = vsyncpa [#allocation3], 0 }
   0x6   :  { %15 = vsyncpa [#allocation3 + $0x1], 0 }
   0x7   :  { %16 = vsyncpa [#allocation6], 0 }
   0x8   :  { %17 = vsyncpa [#allocation4], 0 }
   0x9   :  { %19 = vsyncpa [#allocation4 + $0x1], 0 }
   0xa   :  { %20 = vsyncpa [#allocation9], 0 }
   0xb   :  { %22 = vsyncpa [#allocation9 + $0x1], 0  ;;  %s3169_s24 = smov 0   ;;  %s3171_s25 = smov 0  }
   0xc   :  { %s3173_s26 = smov 0   ;;  %s3175_s27 = smov 0  }
   0xd   :  { %s3177_s28 = smov 0   ;;  %s3179_s29 = smov 0  }
   0xe LB: > { %s3200_s30 = sadd.s32 4294967295, %s3115_s29   ;;  %s4109_s8 = sadd.s32 4294967294, %s3115_s29   ;;  %s3115_s29 = sphi %s3179_s29, %s28_s29   ;;  %s3111_s28 = sphi %s3177_s28, %s4138_s28   ;;  %s3107_s27 = sphi %s3175_s27, %s4137_s27   ;;  %s3103_s26 = sphi %s3173_s26, %s4136_s26   ;;  %s3099_s25 = sphi %s3171_s25, %s4135_s25   ;;  %s3095_s24 = sphi %s3169_s24, %s4134_s24  }
   0xf   : > { %p62_p0 = scmp.ne.s32.totalorder %s3099_s25, %s3095_s24  ;;  %p4106_p1 = scmp.eq.s32.totalorder %s3200_s30, 0 }
  0x10   : > { %p178_p3 = scmp.eq.s32.totalorder %s4109_s8, 1  ;;  %p2107_p5 = scmp.ge.s32.totalorder %s3115_s29, 1 }
  0x11   : > { %p3211_p4 = por %p4106_p1, %p62_p0  ;;  %p241_p7 = scmp.lt.s32.totalorder %s3115_s29, 3 }
  0x12   : > { %p3216_p6 = por %p178_p3, %p62_p0  ;;  %s3117_s12 = smov [#allocation5]  }
  0x13   : > { %s4114_s9 = scalar_select %p3211_p4, 1, 0 }
  0x14   : > { %s4115_s10 = scalar_select %p3216_p6, 1, 0 }
  0x15   : > { %p3221_p8 = pnand %p2107_p5, %p241_p7  ;;  %s259_s13 = sshll.u32 %s3117_s12, 4  ;;  %s260_s13 = int_to_ptr.vmem [resolvable:$true] %s259_s13 }
  0x16   : > { %s40_s15 = sadd.s32 1, %s3111_s28  ;;  %s4118_s3 = sld [smem:[#allocation18_spill]] }
  0x17   : > { %s4116_s11 = scalar_select %p3221_p8, 1, 0 }
  0x18   : > { %p2737_p9 = pneg %p3221_p8 }
  0x1a   : > { %p3230_p11 = pnand %p2737_p9, %p4106_p1 }
  0x1c   : > { %s2911_s18 = scalar_lea.hbm %s4118_s3, 3072  ;;  %p2913_p13 = pneg %p3230_p11 }
  0x1d   : > { %p2912_p12 = scmp.ne.s32.totalorder %s4118_s3, %s2911_s18  ;;  %p2918_p5 = scmp.lt.u32.totalorder %s2911_s18, %s4118_s3 }
  0x1f   : > { %p2914_p0 = pnand %p2913_p13, %p2912_p12 }
  0x21   : > { %p2915_p3 = pneg %p2914_p0 }
  0x23   : > { %p2920_p7 = pnand %p2918_p5, %p2915_p3 }
  0x25   : > { %2923 = shalt.err (!%p2920_p7)
}
  0x26   : > { %s2924_s23 = scalar_lea.vmem %s260_s13, 3072  ;;  %p2932_p2 = scmp.lt.s32.totalorder %s260_s13, %s260_s13 }
  0x27   : > { %p2925_p9 = scmp.ne.s32.totalorder %s260_s13, %s2924_s23  ;;  %p2933_p6 = scmp.lt.s32.totalorder %s2924_s23, %s2924_s23 }
  0x29   : > { %p2927_p10 = pnand %p2925_p9, %p2913_p13  ;;  %p2934_p4 = por %p2933_p6, %p2932_p2 }
  0x2b   : > { %p2928_p1 = pneg %p2927_p10 }
  0x2d   : > { %p2935_p8 = pnand %p2934_p4, %p2928_p1 }
  0x2f   : > { %2938 = shalt.err (!%p2935_p8)
}
  0x30   : > { %s3118_s12 = smov 192   ;;  %s3119_s16 = smov 12  }
  0x31   : > { %2740 = dma.hbm_to_vmem [thread:$0]  (!%p3230_p11), %s4118_s3, 3072, %s260_s13, [#allocation6], %s3118_s12, %s3118_s12, %s3119_s16  }
  0x32   : > { %p42_p1 = scmp.ge.s32.totalorder %s40_s15, 2  ;;  %s49_s19 = sadd.s32 1, %s3103_s26 }
  0x33   : > { %p56_p2 = scmp.ne.s32.totalorder %s3103_s26, %s3099_s25  ;;  %p57_p4 = scmp.eq.s32.totalorder %s3115_s29, 0 }
  0x34   : > { %s4140_s15 = smov (%p42_p1, %s40_s15), 0  ;;  %p4120_p8 = scmp.eq.s32.totalorder %s3200_s30, 1 }
  0x35   : > { %p3257_p6 = por %p57_p4, %p56_p2  ;;  %s44_s14 = ssub.s32 %s3111_s28, %s4140_s15 }
  0x36   : > { %p3263_p10 = por %p4120_p8, %p56_p2  ;;  %p2756_p12 = scmp.lt.s32.totalorder %s3115_s29, 2 }
  0x37   : > { %p47_p11 = scmp.eq.s32.totalorder %s44_s14, 0  ;;  %s276_s13 = sand.u32 1, %s3103_s26  }
  0x38   : > { %s2110_s22 = sshll.u32 %s276_s13, 8  ;;  %s2252_s12 = sshll.u32 %s3111_s28, 12 }
  0x39   : > { %s3272_s23 = scalar_select %p47_p11, %s3103_s26, %s49_s19  }
  0x3a   : > { %s4122_s0 = sld [smem:[#allocation15_spill]]  ;;  %s280_s8 = scalar_lea.vmem [#allocation2], %s2110_s22 }
  0x3b   : > { %s289_s3 = sshll.u32 %s280_s8, 4  ;;  %p3284_p13 = pnand %p2756_p12, %p3257_p6  ;;  %s3280_s3 = int_to_ptr.vmem [resolvable:$true] %s289_s3 }
  0x3c   : > { %s3288_s19 = scalar_lea.sflag [#allocation3], %s276_s13 }
  0x3d   : > { %p2941_p3 = pneg %p3284_p13 }
  0x40   : > { %s3278_s18 = scalar_lea.hbm %s4122_s0, %s2252_s12  ;;  %s2944_s20 = scalar_lea.hbm %s4122_s0, 8192 }
  0x41   : > { %s2939_s16 = scalar_lea.hbm %s3278_s18, 4096  ;;  %p2945_p9 = scmp.lt.u32.totalorder %s3278_s18, %s4122_s0 }
  0x42   : > { %p2940_p0 = scmp.ne.s32.totalorder %s3278_s18, %s2939_s16  ;;  %p2946_p1 = scmp.lt.u32.totalorder %s2944_s20, %s2939_s16 }
  0x43   : > { %p2948_p4 = scmp.lt.u32.totalorder %s2939_s16, %s3278_s18 }
  0x44   : > { %p2942_p5 = pnand %p2941_p3, %p2940_p0  ;;  %p2947_p2 = por %p2946_p1, %p2945_p9 }
  0x46   : > { %p2943_p7 = pneg %p2942_p5  ;;  %p2949_p6 = por %p2948_p4, %p2947_p2 }
  0x48   : > { %p2950_p8 = pnand %p2949_p6, %p2943_p7 }
  0x4a   : > { %2953 = shalt.err (!%p2950_p8)
}
  0x4b   : > { %s2954_s13 = scalar_lea.vmem %s3280_s3, 4096  ;;  %s3120_s8 = smov [#allocation2]  }
  0x4c   : > { %p2955_p12 = scmp.ne.s32.totalorder %s3280_s3, %s2954_s13  ;;  %s2959_s22 = sshll.u32 %s3120_s8, 4  ;;  %s2960_s22 = int_to_ptr.vmem [resolvable:$false] %s2959_s22 }
  0x4d   : > { %s2961_s12 = scalar_lea.vmem %s2960_s22, 8192  ;;  %p2962_p5 = scmp.lt.s32.totalorder %s3280_s3, %s2960_s22 }
  0x4e   : > { %p2957_p11 = pnand %p2955_p12, %p2941_p3  ;;  %p2963_p9 = scmp.lt.s32.totalorder %s2961_s12, %s2954_s13 }
  0x50   : > { %p2958_p0 = pneg %p2957_p11  ;;  %p2964_p1 = por %p2963_p9, %p2962_p5 }
  0x52   : > { %p2965_p2 = pnand %p2964_p1, %p2958_p0 }
  0x54   : > { %2968 = shalt.err (!%p2965_p2)
}
  0x55   : > { %s3121_s16 = smov 128   ;;  %s3122_s20 = smov 8  }
  0x56   : > { %2744 = dma.hbm_to_vmem [thread:$0]  (!%p3284_p13), %s3278_s18, 4096, %s3280_s3, %s3288_s19, %s3121_s16, %s3121_s16, %s3122_s20  }
  0x57   : > { %p4124_p3 = scmp.ne.s32.totalorder %s4116_s11, 0 }
  0x58   : > { %s3319_s17 = sand.u32 (!%p4124_p3), 1, %s3099_s25   ;;  %p4125_p7 = scmp.ne.s32.totalorder (!%p4124_p3), %s4114_s9, 0 }
  0x59   : > { %301 = sbr.rel (%p4124_p3) target bundleno = 786 (0x312), region = 40  ;;  %s2114_s13 = sshll.u32 (!%p4124_p3), %s3319_s17, 8 }
  0x5a   : > { %s304_s8 = scalar_lea.sflag (!%p4124_p3), [#allocation3], %s3319_s17  ;;  %s3323_s22 = scalar_lea.vmem (!%p4124_p3), [#allocation2], %s2114_s13 }
  0x60   : > { %3078 = dma.done.wait (%p4125_p7), %s304_s8, 4096  }
  0x61   : > { %3080 = vsyncadd (%p4125_p7), %s304_s8, 4294963200  ;;  %p4126_p13 = scmp.eq.s32.totalorder %s3200_s30, 0 }
  0x63   : > { %3082 = dma.done.wait (%p4126_p13), [#allocation6], 3072   ;;  %p4127_p4 = pmov %p4126_p13 }
  0x64   : > { %v3334_v0 = vld [vmem:[%s3323_s22] sm:$0xff]  ;;  %v3342_v2 = vld [vmem:[%s3323_s22 + $0x8] sm:$0xff]  ;;  %v3350_v4 = vld [vmem:[%s3323_s22 + $0x10] sm:$0xff]  ;;  %s4128_s1 = sld [smem:[#allocation16_spill]]  ;;  %s4129_s2 = sld [smem:[#allocation17_spill]] }
  0x65   : > { %3084 = vsyncadd (%p4127_p4), [#allocation6], 4294964224  ;;  %v3337_v1 = vld [vmem:[%s3323_s22 + $0xc0] sm:$0xff]  ;;  %391 = vadd.xlane.f32.xlu0 %v3334_v0  ;;  %v3345_v3 = vld [vmem:[%s3323_s22 + $0xc8] sm:$0xff]  ;;  %s3796_s12 = sshll.u32 %s3319_s17, 7  ;;  %s4130_s19 = sand.u32 1, %s3200_s30  }
  0x66   : > { %439 = vadd.xlane.f32.xlu1 %v3337_v1  ;;  %v3353_v5 = vld [vmem:[%s3323_s22 + $0x18] sm:$0xff]  ;;  %v3358_v6 = vld [vmem:[%s3323_s22 + $0xd0] sm:$0xff]  ;;  %v3364_v8 = vld [vmem:[%s3323_s22 + $0x20] sm:$0xff]  ;;  %s3804_s16 = scalar_lea.vmem [#allocation8], %s3796_s12  ;;  %s3810_s20 = scalar_lea.vmem [#allocation7], %s3796_s12 }
  0x67   : > { %v3361_v7 = vld [vmem:[%s3323_s22 + $0xd8] sm:$0xff]  ;;  %v3367_v9 = vld [vmem:[%s3323_s22 + $0x28] sm:$0xff]  ;;  %v3372_v10 = vld [vmem:[%s3323_s22 + $0xe0] sm:$0xff]  ;;  %s3867_s13 = scalar_lea.vmem [#allocation10], %s3796_s12  ;;  %s1923_s3 = sshll.u32 %s3804_s16, 4  ;;  %s3956_s3 = int_to_ptr.vmem [resolvable:$true] %s1923_s3 }
  0x68   : > { %v3375_v11 = vld [vmem:[%s3323_s22 + $0xe8] sm:$0xff]  ;;  %v3382_v12 = vld [vmem:[%s3323_s22 + $0x30] sm:$0xff]  ;;  %v3385_v13 = vld [vmem:[%s3323_s22 + $0x38] sm:$0xff]  ;;  %s1905_s9 = sshll.u32 %s3810_s20, 4  ;;  %s1941_s14 = sshll.u32 %s3867_s13, 4  ;;  %s3969_s9 = int_to_ptr.vmem [resolvable:$true] %s1905_s9  ;;  %s3983_s14 = int_to_ptr.vmem [resolvable:$true] %s1941_s14 }
  0x69   : > { %393 = vadd.xlane.f32.xlu0 %v3342_v2  ;;  %v3390_v14 = vld [vmem:[%s3323_s22 + $0xf0] sm:$0xff]  ;;  %v3393_v15 = vld [vmem:[%s3323_s22 + $0xf8] sm:$0xff]  ;;  %v3398_v16 = vld [vmem:[%s3323_s22 + $0x40] sm:$0xff]  ;;  %s2969_s12 = scalar_lea.vmem %s3956_s3, 2048 }
  0x6a   : > { %441 = vadd.xlane.f32.xlu1 %v3345_v3  ;;  %v3401_v17 = vld [vmem:[%s3323_s22 + $0x48] sm:$0xff]  ;;  %v3406_v18 = vld [vmem:[%s3323_s22 + $0x50] sm:$0xff]  ;;  %v3409_v19 = vld [vmem:[%s3323_s22 + $0x58] sm:$0xff]  ;;  %p2970_p6 = scmp.ne.s32.totalorder %s3956_s3, %s2969_s12 }
  0x6b   : > { %v3414_v20 = vld [vmem:[%s3323_s22 + $0x60] sm:$0xff]  ;;  %v3417_v21 = vld [vmem:[%s3323_s22 + $0x68] sm:$0xff]  ;;  %v3422_v22 = vld [vmem:[%s3323_s22 + $0x70] sm:$0xff] }
  0x6c   : > { %v3425_v23 = vld [vmem:[%s3323_s22 + $0x78] sm:$0xff]  ;;  %v3430_v24 = vld [vmem:[%s3323_s22 + $0x80] sm:$0xff]  ;;  %v3433_v25 = vld [vmem:[%s3323_s22 + $0x88] sm:$0xff]  ;;  %p2971_p8 = pnand %p2970_p6, %p3263_p10 }
  0x6d   : > { %395 = vadd.xlane.f32.xlu0 %v3350_v4  ;;  %v3438_v26 = vld [vmem:[%s3323_s22 + $0x90] sm:$0xff]  ;;  %v3441_v27 = vld [vmem:[%s3323_s22 + $0x98] sm:$0xff]  ;;  %v3446_v28 = vld [vmem:[%s3323_s22 + $0xa0] sm:$0xff] }
  0x6e   : > { %397 = vadd.xlane.f32.xlu1 %v3353_v5  ;;  %v3449_v29 = vld [vmem:[%s3323_s22 + $0xa8] sm:$0xff]  ;;  %v3454_v30 = vld [vmem:[%s3323_s22 + $0xb0] sm:$0xff]  ;;  %v3457_v31 = vld [vmem:[%s3323_s22 + $0xb8] sm:$0xff]  ;;  %s2349_s22 = sshll.u32 %s3107_s27, 11  ;;  %p2972_p12 = pneg %p2971_p8 }
  0x6f   : > { %v2815_v32 = vld [vmem:[#allocation5 + $0x4] ss:$12 sps:$4 sm:$0xff]   ;;  %v2817_v33 = vld [vmem:[#allocation5] ss:$12 sps:$4 sm:$0xff]   ;;  %v2818_v34 = vld [vmem:[#allocation5 + $0x1c] ss:$12 sps:$4 sm:$0xff]   ;;  %s3953_s27 = scalar_lea.hbm %s4104_s6, %s2349_s22  ;;  %s3967_s11 = scalar_lea.hbm %s4103_s5, %s2349_s22 }
  0x70   : > { %1013 = vmatprep.subr.bf16.mxu0 %v2815_v32  ;;  %2709 = vmatprep.subr.bf16.mxu1 %v2815_v32  ;;  %s3981_s0 = scalar_lea.hbm %s4105_s7, %s2349_s22 }
  0x71   : > { %443 = vadd.xlane.f32.xlu0 %v3358_v6  ;;  %1014 = vmatpush1.bf16.msra.mxu0 %v2817_v33 }
  0x72   : > { %445 = vadd.xlane.f32.xlu1 %v3361_v7  ;;  %2717 = vmatpush1.bf16.msra.mxu1 %v2817_v33  ;;  %v2820_v33 = vld [vmem:[#allocation5 + $0x18] ss:$12 sps:$4 sm:$0xff]  }
  0x73   : > { %1015 = vmatprep.subr.bf16.mxu0 %v2818_v34  ;;  %2710 = vmatprep.subr.bf16.mxu1 %v2818_v34 }
  0x75   : > { %399 = vadd.xlane.f32.xlu0 %v3364_v8  ;;  %1016 = vmatpush1.bf16.msra.mxu0 %v2820_v33 }
  0x76   : > { %401 = vadd.xlane.f32.xlu1 %v3367_v9  ;;  %2718 = vmatpush1.bf16.msra.mxu1 %v2820_v33 }
  0x79   : > { %447 = vadd.xlane.f32.xlu0 %v3372_v10 }
  0x7a   : > { %449 = vadd.xlane.f32.xlu1 %v3375_v11 }
  0x7d   : > { %403 = vadd.xlane.f32.xlu0 %v3382_v12 }
  0x7e   : > { %405 = vadd.xlane.f32.xlu1 %v3385_v13 }
  0x81   : > { %451 = vadd.xlane.f32.xlu0 %v3390_v14 }
  0x82   : > { %453 = vadd.xlane.f32.xlu1 %v3393_v15 }
  0x85   : > { %407 = vadd.xlane.f32.xlu0 %v3398_v16 }
  0x86   : > { %409 = vadd.xlane.f32.xlu1 %v3401_v17 }
  0x89   : > { %411 = vadd.xlane.f32.xlu0 %v3406_v18 }
  0x8a   : > { %413 = vadd.xlane.f32.xlu1 %v3409_v19 }
  0x8d   : > { %415 = vadd.xlane.f32.xlu0 %v3414_v20 }
  0x8e   : > { %417 = vadd.xlane.f32.xlu1 %v3417_v21 }
  0x91   : > { %419 = vadd.xlane.f32.xlu0 %v3422_v22 }
  0x92   : > { %421 = vadd.xlane.f32.xlu1 %v3425_v23 }
  0x95   : > { %423 = vadd.xlane.f32.xlu0 %v3430_v24 }
  0x96   : > { %425 = vadd.xlane.f32.xlu1 %v3433_v25 }
  0x99   : > { %427 = vadd.xlane.f32.xlu0 %v3438_v26 }
  0x9a   : > { %429 = vadd.xlane.f32.xlu1 %v3441_v27 }
  0x9d   : > { %431 = vadd.xlane.f32.xlu0 %v3446_v28 }
  0x9e   : > { %433 = vadd.xlane.f32.xlu1 %v3449_v29 }
  0xa1   : > { %435 = vadd.xlane.f32.xlu0 %v3454_v30 }
  0xa2   : > { %437 = vadd.xlane.f32.xlu1 %v3457_v31 }
  0xf2   : > { %v392_v35 = vpop.xlane.xlu0 %391 }
  0xf3   : > { %v440_v36 = vpop.xlane.xlu1 %439  ;;  %v456_v37 = vmul.f32 0.0078125, %v392_v35 }
  0xf4   : > { %v480_v38 = vmul.f32 0.0078125, %v440_v36 }
  0xf5   : > { %v3462_v39 = vsub.f32 %v3334_v0, %v456_v37 }
  0xf6   : > { %v3465_v40 = vsub.f32 %v3337_v1, %v480_v38  ;;  %v394_v41 = vpop.xlane.xlu0 %393 }
  0xf7   : > { %v442_v42 = vpop.xlane.xlu1 %441  ;;  %v457_v43 = vmul.f32 0.0078125, %v394_v41  ;;  %v520_v44 = vmul.f32 %v3462_v39, %v3462_v39 }
  0xf8   : > { %v481_v45 = vmul.f32 0.0078125, %v442_v42  ;;  %v544_v48 = vmul.f32 %v3465_v40, %v3465_v40 }
  0xf9   : > { %v3470_v46 = vsub.f32 %v3342_v2, %v457_v43  ;;  %552 = vadd.xlane.f32.xlu0 %v520_v44 }
  0xfa   : > { %v3473_v47 = vsub.f32 %v3345_v3, %v481_v45  ;;  %v396_v49 = vpop.xlane.xlu0 %395  ;;  %v2823_v45 = vld [vmem:[#allocation5 + $0x30] ss:$12 sps:$4 sm:$0xff]  }
  0xfb   : > { %v398_v50 = vpop.xlane.xlu1 %397  ;;  %v458_v51 = vmul.f32 0.0078125, %v396_v49  ;;  %v521_v52 = vmul.f32 %v3470_v46, %v3470_v46 }
  0xfc   : > { %v459_v53 = vmul.f32 0.0078125, %v398_v50  ;;  %v545_v56 = vmul.f32 %v3473_v47, %v3473_v47 }
  0xfd   : > { %v3480_v54 = vsub.f32 %v3350_v4, %v458_v51  ;;  %600 = vadd.xlane.f32.xlu0 %v544_v48  ;;  %554 = vadd.xlane.f32.xlu1 %v521_v52  ;;  %v2824_v52 = vld [vmem:[#allocation5 + $0x4c] ss:$12 sps:$4 sm:$0xff]  }
  0xfe   : > { %v3483_v55 = vsub.f32 %v3353_v5, %v459_v53  ;;  %v444_v57 = vpop.xlane.xlu0 %443 }
  0xff   : > { %v446_v58 = vpop.xlane.xlu1 %445  ;;  %v482_v59 = vmul.f32 0.0078125, %v444_v57  ;;  %v522_v60 = vmul.f32 %v3480_v54, %v3480_v54  ;;  %v2826_v57 = vld [vmem:[#allocation5 + $0x48] ss:$12 sps:$4 sm:$0xff]  }
 0x100   : > { %v483_v61 = vmul.f32 0.0078125, %v446_v58  ;;  %v523_v0 = vmul.f32 %v3483_v55, %v3483_v55 }
 0x101   : > { %v3490_v62 = vsub.f32 %v3358_v6, %v482_v59  ;;  %602 = vadd.xlane.f32.xlu1 %v545_v56  ;;  %556 = vadd.xlane.f32.xlu0 %v522_v60 }
 0x102   : > { %v3493_v63 = vsub.f32 %v3361_v7, %v483_v61  ;;  %v400_v1 = vpop.xlane.xlu0 %399 }
 0x103   : > { %v402_v2 = vpop.xlane.xlu1 %401  ;;  %v460_v3 = vmul.f32 0.0078125, %v400_v1  ;;  %v546_v4 = vmul.f32 %v3490_v62, %v3490_v62 }
 0x104   : > { %v461_v5 = vmul.f32 0.0078125, %v402_v2  ;;  %v547_v7 = vmul.f32 %v3493_v63, %v3493_v63 }
 0x105   : > { %v3500_v32 = vsub.f32 %v3364_v8, %v460_v3  ;;  %558 = vadd.xlane.f32.xlu1 %v523_v0  ;;  %604 = vadd.xlane.f32.xlu0 %v546_v4  ;;  %v2821_v8 = vld [vmem:[#allocation5 + $0x34] ss:$12 sps:$4 sm:$0xff]   ;;  %v2827_v0 = vld [vmem:[#allocation5 + $0x64] ss:$12 sps:$4 sm:$0xff]  }
 0x106   : > { %v3503_v6 = vsub.f32 %v3367_v9, %v461_v5  ;;  %v448_v34 = vpop.xlane.xlu0 %447  ;;  %1017 = vmatprep.subr.bf16.mxu0 %v2821_v8  ;;  %2711 = vmatprep.subr.bf16.mxu1 %v2821_v8  ;;  %v2829_v3 = vld [vmem:[#allocation5 + $0x60] ss:$12 sps:$4 sm:$0xff]  }
 0x107   : > { %v450_v35 = vpop.xlane.xlu1 %449  ;;  %v484_v36 = vmul.f32 0.0078125, %v448_v34  ;;  %v524_v37 = vmul.f32 %v3500_v32, %v3500_v32  ;;  %1018 = vmatpush1.bf16.msra.mxu0 %v2823_v45  ;;  %2719 = vmatpush1.bf16.msra.mxu1 %v2823_v45  ;;  %v2830_v34 = vld [vmem:[#allocation5 + $0x7c] ss:$12 sps:$4 sm:$0xff]  }
 0x108   : > { %v485_v38 = vmul.f32 0.0078125, %v450_v35  ;;  %v525_v42 = vmul.f32 %v3503_v6, %v3503_v6  ;;  %1019 = vmatprep.subr.bf16.mxu0 %v2824_v52  ;;  %2712 = vmatprep.subr.bf16.mxu1 %v2824_v52 }
 0x109   : > { %v3510_v41 = vsub.f32 %v3372_v10, %v484_v36  ;;  %606 = vadd.xlane.f32.xlu1 %v547_v7  ;;  %560 = vadd.xlane.f32.xlu0 %v524_v37  ;;  %v2832_v37 = vld [vmem:[#allocation5 + $0x78] ss:$12 sps:$4 sm:$0xff]  }
 0x10a   : > { %v3513_v9 = vsub.f32 %v3375_v11, %v485_v38  ;;  %v404_v43 = vpop.xlane.xlu0 %403 }
 0x10b   : > { %v406_v44 = vpop.xlane.xlu1 %405  ;;  %v462_v48 = vmul.f32 0.0078125, %v404_v43  ;;  %v548_v49 = vmul.f32 %v3510_v41, %v3510_v41  ;;  %1020 = vmatpush1.bf16.msra.mxu0 %v2826_v57  ;;  %2720 = vmatpush1.bf16.msra.mxu1 %v2826_v57 }
 0x10c   : > { %v463_v50 = vmul.f32 0.0078125, %v406_v44  ;;  %v549_v51 = vmul.f32 %v3513_v9, %v3513_v9  ;;  %1021 = vmatprep.subr.bf16.mxu0 %v2827_v0  ;;  %2713 = vmatprep.subr.bf16.mxu1 %v2827_v0  ;;  %v2833_v44 = vld [vmem:[#allocation5 + $0x94] ss:$12 sps:$4 sm:$0xff]  }
 0x10d   : > { %v3520_v10 = vsub.f32 %v3382_v12, %v462_v48  ;;  %562 = vadd.xlane.f32.xlu1 %v525_v42  ;;  %608 = vadd.xlane.f32.xlu0 %v548_v49  ;;  %v2835_v49 = vld [vmem:[#allocation5 + $0x90] ss:$12 sps:$4 sm:$0xff]  }
 0x10e   : > { %v3523_v11 = vsub.f32 %v3385_v13, %v463_v50  ;;  %v452_v53 = vpop.xlane.xlu0 %451 }
 0x10f   : > { %v454_v56 = vpop.xlane.xlu1 %453  ;;  %v486_v58 = vmul.f32 0.0078125, %v452_v53  ;;  %v526_v59 = vmul.f32 %v3520_v10, %v3520_v10  ;;  %1022 = vmatpush1.bf16.msra.mxu0 %v2829_v3  ;;  %2721 = vmatpush1.bf16.msra.mxu1 %v2829_v3 }
 0x110   : > { %v487_v60 = vmul.f32 0.0078125, %v454_v56  ;;  %v527_v61 = vmul.f32 %v3523_v11, %v3523_v11  ;;  %1023 = vmatprep.subr.bf16.mxu0 %v2830_v34  ;;  %2714 = vmatprep.subr.bf16.mxu1 %v2830_v34  ;;  %v2836_v56 = vld [vmem:[#allocation5 + $0xac] ss:$12 sps:$4 sm:$0xff]  }
 0x111   : > { %v3530_v12 = vsub.f32 %v3390_v14, %v486_v58  ;;  %610 = vadd.xlane.f32.xlu1 %v549_v51  ;;  %564 = vadd.xlane.f32.xlu0 %v526_v59  ;;  %v2838_v59 = vld [vmem:[#allocation5 + $0xa8] ss:$12 sps:$4 sm:$0xff]  }
 0x112   : > { %v3533_v13 = vsub.f32 %v3393_v15, %v487_v60  ;;  %v408_v1 = vpop.xlane.xlu0 %407 }
 0x113   : > { %v410_v2 = vpop.xlane.xlu1 %409  ;;  %v464_v4 = vmul.f32 0.0078125, %v408_v1  ;;  %v550_v5 = vmul.f32 %v3530_v12, %v3530_v12  ;;  %1024 = vmatpush1.bf16.msra.mxu0 %v2832_v37  ;;  %2722 = vmatpush1.bf16.msra.mxu1 %v2832_v37 }
 0x114   : > { %v465_v7 = vmul.f32 0.0078125, %v410_v2  ;;  %v551_v33 = vmul.f32 %v3533_v13, %v3533_v13  ;;  %1025 = vmatprep.subr.bf16.mxu0 %v2833_v44  ;;  %2715 = vmatprep.subr.bf16.mxu1 %v2833_v44 }
 0x115   : > { %v3540_v14 = vsub.f32 %v3398_v16, %v464_v4  ;;  %566 = vadd.xlane.f32.xlu1 %v527_v61  ;;  %612 = vadd.xlane.f32.xlu0 %v550_v5  ;;  %v3123_v4 = vmov 0  }
 0x116   : > { %v3543_v15 = vsub.f32 %v3401_v17, %v465_v7  ;;  %v412_v35 = vpop.xlane.xlu0 %411  ;;  %1045 = vmatprep.mubr.bf16.mxu0 %v3123_v4  ;;  %1165 = vmatprep.mubr.bf16.mxu1 %v3123_v4 }
 0x117   : > { %v414_v36 = vpop.xlane.xlu1 %413  ;;  %v466_v38 = vmul.f32 0.0078125, %v412_v35  ;;  %v528_v8 = vmul.f32 %v3540_v14, %v3540_v14  ;;  %1026 = vmatpush1.bf16.msra.mxu0 %v2835_v49  ;;  %2723 = vmatpush1.bf16.msra.mxu1 %v2835_v49  ;;  %v3589_v35 = vld [vmem:[#allocation5 + $0x8] ss:$12 sps:$4 sm:$0xff]  }
 0x118   : > { %v467_v42 = vmul.f32 0.0078125, %v414_v36  ;;  %v529_v43 = vmul.f32 %v3543_v15, %v3543_v15  ;;  %1027 = vmatprep.subr.bf16.mxu0 %v2836_v56  ;;  %2716 = vmatprep.subr.bf16.mxu1 %v2836_v56 }
 0x119   : > { %v3550_v16 = vsub.f32 %v3406_v18, %v466_v38  ;;  %614 = vadd.xlane.f32.xlu1 %v551_v33  ;;  %568 = vadd.xlane.f32.xlu0 %v528_v8 }
 0x11a   : > { %v3553_v17 = vsub.f32 %v3409_v19, %v467_v42  ;;  %v416_v45 = vpop.xlane.xlu0 %415 }
 0x11b   : > { %v418_v48 = vpop.xlane.xlu1 %417  ;;  %v468_v50 = vmul.f32 0.0078125, %v416_v45  ;;  %v530_v51 = vmul.f32 %v3550_v16, %v3550_v16  ;;  %1028 = vmatpush1.bf16.msra.mxu0 %v2838_v59  ;;  %2724 = vmatpush1.bf16.msra.mxu1 %v2838_v59 }
 0x11c   : > { %v469_v52 = vmul.f32 0.0078125, %v418_v48  ;;  %v531_v53 = vmul.f32 %v3553_v17, %v3553_v17  ;;  %2661 = vmatprep.subr.bf16.mxu1 %v3589_v35 }
 0x11d   : > { %v3560_v18 = vsub.f32 %v3414_v20, %v468_v50  ;;  %570 = vadd.xlane.f32.xlu1 %v529_v43  ;;  %572 = vadd.xlane.f32.xlu0 %v530_v51 }
 0x11e   : > { %v3563_v19 = vsub.f32 %v3417_v21, %v469_v52  ;;  %v420_v57 = vpop.xlane.xlu0 %419 }
 0x11f   : > { %v422_v58 = vpop.xlane.xlu1 %421  ;;  %v470_v60 = vmul.f32 0.0078125, %v420_v57  ;;  %v532_v61 = vmul.f32 %v3560_v18, %v3560_v18 }
 0x120   : > { %v471_v0 = vmul.f32 0.0078125, %v422_v58  ;;  %v533_v1 = vmul.f32 %v3563_v19, %v3563_v19 }
 0x121   : > { %v3570_v20 = vsub.f32 %v3422_v22, %v470_v60  ;;  %574 = vadd.xlane.f32.xlu1 %v531_v53  ;;  %576 = vadd.xlane.f32.xlu0 %v532_v61 }
 0x122   : > { %v3573_v21 = vsub.f32 %v3425_v23, %v471_v0  ;;  %v424_v2 = vpop.xlane.xlu0 %423 }
 0x123   : > { %v426_v3 = vpop.xlane.xlu1 %425  ;;  %v472_v5 = vmul.f32 0.0078125, %v424_v2  ;;  %v534_v22 = vmul.f32 %v3570_v20, %v3570_v20 }
 0x124   : > { %v473_v7 = vmul.f32 0.0078125, %v426_v3  ;;  %v535_v34 = vmul.f32 %v3573_v21, %v3573_v21 }
 0x125   : > { %v3582_v33 = vsub.f32 %v3430_v24, %v472_v5  ;;  %578 = vadd.xlane.f32.xlu1 %v533_v1  ;;  %580 = vadd.xlane.f32.xlu0 %v534_v22 }
 0x126   : > { %v3585_v23 = vsub.f32 %v3433_v25, %v473_v7  ;;  %v428_v36 = vpop.xlane.xlu0 %427 }
 0x127   : > { %v430_v37 = vpop.xlane.xlu1 %429  ;;  %v474_v38 = vmul.f32 0.0078125, %v428_v36  ;;  %v536_v8 = vmul.f32 %v3582_v33, %v3582_v33 }
 0x128   : > { %v475_v42 = vmul.f32 0.0078125, %v430_v37  ;;  %v537_v43 = vmul.f32 %v3585_v23, %v3585_v23 }
 0x129   : > { %v3595_v24 = vsub.f32 %v3438_v26, %v474_v38  ;;  %582 = vadd.xlane.f32.xlu1 %v535_v34  ;;  %584 = vadd.xlane.f32.xlu0 %v536_v8 }
 0x12a   : > { %v3598_v25 = vsub.f32 %v3441_v27, %v475_v42  ;;  %v432_v44 = vpop.xlane.xlu0 %431 }
 0x12b   : > { %v434_v45 = vpop.xlane.xlu1 %433  ;;  %v476_v48 = vmul.f32 0.0078125, %v432_v44  ;;  %v538_v49 = vmul.f32 %v3595_v24, %v3595_v24 }
 0x12c   : > { %v477_v50 = vmul.f32 0.0078125, %v434_v45  ;;  %v539_v27 = vmul.f32 %v3598_v25, %v3598_v25 }
 0x12d   : > { %v3605_v51 = vsub.f32 %v3446_v28, %v476_v48  ;;  %586 = vadd.xlane.f32.xlu1 %v537_v43  ;;  %588 = vadd.xlane.f32.xlu0 %v538_v49 }
 0x12e   : > { %v3608_v26 = vsub.f32 %v3449_v29, %v477_v50  ;;  %v436_v52 = vpop.xlane.xlu0 %435 }
 0x12f   : > { %v438_v53 = vpop.xlane.xlu1 %437  ;;  %v478_v56 = vmul.f32 0.0078125, %v436_v52  ;;  %v540_v57 = vmul.f32 %v3605_v51, %v3605_v51 }
 0x130   : > { %v479_v58 = vmul.f32 0.0078125, %v438_v53  ;;  %v541_v29 = vmul.f32 %v3608_v26, %v3608_v26 }
 0x131   : > { %v3615_v59 = vsub.f32 %v3454_v30, %v478_v56  ;;  %590 = vadd.xlane.f32.xlu1 %v539_v27  ;;  %592 = vadd.xlane.f32.xlu0 %v540_v57 }
 0x132   : > { %v3618_v28 = vsub.f32 %v3457_v31, %v479_v58 }
 0x133   : > { %v542_v60 = vmul.f32 %v3615_v59, %v3615_v59 }
 0x134   : > { %v543_v61 = vmul.f32 %v3618_v28, %v3618_v28 }
 0x135   : > { %594 = vadd.xlane.f32.xlu1 %v541_v29  ;;  %596 = vadd.xlane.f32.xlu0 %v542_v60  ;;  %v3630_v29 = vld [vmem:[%s4128_s1] ss:$0 sm:$0xff]  ;;  %s3124_s1 = smov [#allocation8]  }
 0x139   : > { %598 = vadd.xlane.f32.xlu1 %v543_v61 }
 0x186   : > { %v553_v0 = vpop.xlane.xlu0 %552 }
 0x187   : > { %v616_v30 = vmul.f32 0.0078125, %v553_v0 }
 0x189   : > { %v648_v1 = vadd.f32 1e-05, %v616_v30 }
 0x18a   : > { %v555_v2 = vpop.xlane.xlu1 %554  ;;  %v601_v3 = vpop.xlane.xlu0 %600 }
 0x18b   : > { %2847 = vrsqrt.f32 %v648_v1  ;;  %v617_v31 = vmul.f32 0.0078125, %v555_v2  ;;  %v640_v5 = vmul.f32 0.0078125, %v601_v3 }
 0x18d   : > { %v649_v22 = vadd.f32 1e-05, %v617_v31  ;;  %v672_v7 = vadd.f32 1e-05, %v640_v5 }
 0x18e   : > { %v603_v34 = vpop.xlane.xlu1 %602  ;;  %v557_v36 = vpop.xlane.xlu0 %556 }
 0x18f   : > { %2849 = vrsqrt.f32 %v649_v22  ;;  %v641_v37 = vmul.f32 0.0078125, %v603_v34  ;;  %v618_v38 = vmul.f32 0.0078125, %v557_v36  ;;  %v3637_v22 = vld [vmem:[%s4129_s2] ss:$0 sm:$0xff]  ;;  %s2973_s2 = sshll.u32 %s3124_s1, 4  ;;  %s2974_s2 = int_to_ptr.vmem [resolvable:$false] %s2973_s2 }
 0x190   : > { %2851 = vrsqrt.f32 %v672_v7  ;;  %s2975_s8 = scalar_lea.vmem %s2974_s2, 4096  ;;  %p2976_p11 = scmp.lt.s32.totalorder %s3956_s3, %s2974_s2 }
 0x191   : > { %v673_v8 = vadd.f32 1e-05, %v641_v37  ;;  %v650_v42 = vadd.f32 1e-05, %v618_v38  ;;  %p2977_p0 = scmp.lt.s32.totalorder %s2975_s8, %s2969_s12 }
 0x192   : > { %v559_v43 = vpop.xlane.xlu1 %558  ;;  %v605_v44 = vpop.xlane.xlu0 %604 }
 0x193   : > { %2853 = vrsqrt.f32 %v673_v8  ;;  %v619_v45 = vmul.f32 0.0078125, %v559_v43  ;;  %v642_v48 = vmul.f32 0.0078125, %v605_v44  ;;  %p2978_p5 = por %p2977_p0, %p2976_p11 }
 0x194   : > { %2855 = vrsqrt.f32 %v650_v42 }
 0x195   : > { %v2848_v49 = vpop.eup %2847  ;;  %v651_v50 = vadd.f32 1e-05, %v619_v45  ;;  %v674_v27 = vadd.f32 1e-05, %v642_v48  ;;  %p2979_p9 = pnand %p2978_p5, %p2972_p12 }
 0x196   : > { %v607_v52 = vpop.xlane.xlu1 %606  ;;  %v561_v53 = vpop.xlane.xlu0 %560  ;;  %v712_v56 = vmul.f32 %v2848_v49, %v3462_v39 }
 0x197   : > { %2857 = vrsqrt.f32 %v651_v50  ;;  %v643_v57 = vmul.f32 0.0078125, %v607_v52  ;;  %v620_v58 = vmul.f32 0.0078125, %v561_v53 }
 0x198   : > { %2859 = vrsqrt.f32 %v674_v27  ;;  %v750_v31 = vmul.f32 %v3630_v29, %v712_v56 }
 0x199   : > { %v2850_v60 = vpop.eup %2849  ;;  %v675_v61 = vadd.f32 1e-05, %v643_v57  ;;  %v652_v0 = vadd.f32 1e-05, %v620_v58 }
 0x19a   : > { %v2852_v30 = vpop.eup %2851  ;;  %v563_v1 = vpop.xlane.xlu1 %562  ;;  %v713_v3 = vmul.f32 %v2850_v60, %v3470_v46  ;;  %v788_v43 = vadd.f32 %v3637_v22, %v750_v31 }
 0x19b   : > { %v609_v2 = vpop.xlane.xlu0 %608  ;;  %2861 = vrsqrt.f32 %v675_v61  ;;  %v621_v39 = vmul.f32 0.0078125, %v563_v1  ;;  %v736_v7 = vmul.f32 %v2852_v30, %v3465_v40 }
 0x19c   : > { %v644_v5 = vmul.f32 0.0078125, %v609_v2  ;;  %2863 = vrsqrt.f32 %v652_v0  ;;  %v751_v34 = vmul.f32 %v3630_v29, %v713_v3 }
 0x19d   : > { %v2854_v36 = vpop.eup %2853  ;;  %v653_v37 = vadd.f32 1e-05, %v621_v39  ;;  %v774_v48 = vmul.f32 %v3630_v29, %v736_v7  ;;  %v2840_v39 = vld [vmem:[#allocation5 + $0x20] ss:$12 sps:$4 sm:$0xff]  }
 0x19e   : > { %v676_v38 = vadd.f32 1e-05, %v644_v5  ;;  %v2856_v8 = vpop.eup %2855  ;;  %v611_v46 = vpop.xlane.xlu1 %610  ;;  %v789_v44 = vadd.f32 %v3637_v22, %v751_v34  ;;  %v737_v45 = vmul.f32 %v2854_v36, %v3473_v47 }
 0x19f   : > { %v565_v42 = vpop.xlane.xlu0 %564  ;;  %2865 = vrsqrt.f32 %v653_v37  ;;  %v645_v49 = vmul.f32 0.0078125, %v611_v46  ;;  %v714_v52 = vmul.f32 %v2856_v8, %v3480_v54  ;;  %v812_v61 = vadd.f32 %v3637_v22, %v774_v48  ;;  %v2841_v48 = vld [vmem:[#allocation5 + $0x38] ss:$12 sps:$4 sm:$0xff]  }
 0x1a0   : > { %v622_v40 = vmul.f32 0.0078125, %v565_v42  ;;  %2867 = vrsqrt.f32 %v676_v38  ;;  %v3645_v50 = vpack.c.bf16 %v789_v44, %v788_v43  ;;  %v775_v27 = vmul.f32 %v3630_v29, %v737_v45 }
 0x1a1   : > { %v2858_v53 = vpop.eup %2857  ;;  %v677_v56 = vadd.f32 1e-05, %v645_v49  ;;  %v752_v1 = vmul.f32 %v3630_v29, %v714_v52 }
 0x1a2   : > { %v654_v57 = vadd.f32 1e-05, %v622_v40  ;;  %v2860_v58 = vpop.eup %2859  ;;  %v567_v60 = vpop.xlane.xlu1 %566  ;;  %1046 = vmatmul.mubr.bf16.vlgmr.msra.gmra.mrb[0].mxu0 %v3645_v50  ;;  %v813_v0 = vadd.f32 %v3637_v22, %v775_v27  ;;  %v715_v30 = vmul.f32 %v2858_v53, %v3483_v55 }
 0x1a3   : > { %v613_v47 = vpop.xlane.xlu0 %612  ;;  %2869 = vrsqrt.f32 %v677_v56  ;;  %v623_v2 = vmul.f32 0.0078125, %v567_v60  ;;  %1055 = vmatprep.mubr.bf16.mxu0 %v3123_v4  ;;  %v738_v54 = vmul.f32 %v2860_v58, %v3490_v62  ;;  %v790_v8 = vadd.f32 %v3637_v22, %v752_v1  ;;  %v2842_v1 = vld [vmem:[#allocation5 + $0x50] ss:$12 sps:$4 sm:$0xff]  }
 0x1a4   : > { %v646_v3 = vmul.f32 0.0078125, %v613_v47  ;;  %2871 = vrsqrt.f32 %v654_v57  ;;  %v3656_v31 = vpack.c.bf16 %v813_v0, %v812_v61  ;;  %v753_v5 = vmul.f32 %v3630_v29, %v715_v30 }
 0x1a5   : > { %v2862_v7 = vpop.eup %2861  ;;  %v655_v34 = vadd.f32 1e-05, %v623_v2  ;;  %v776_v42 = vmul.f32 %v3630_v29, %v738_v54 }
 0x1a6   : > { %v678_v36 = vadd.f32 1e-05, %v646_v3  ;;  %v2864_v37 = vpop.eup %2863  ;;  %v615_v55 = vpop.xlane.xlu1 %614  ;;  %1166 = vmatmul.mubr.bf16.vlgmr.msra.gmra.mrb[0].mxu1 %v3656_v31  ;;  %v791_v46 = vadd.f32 %v3637_v22, %v753_v5  ;;  %v739_v62 = vmul.f32 %v2862_v7, %v3493_v63 }
 0x1a7   : > { %v569_v38 = vpop.xlane.xlu0 %568  ;;  %2873 = vrsqrt.f32 %v655_v34  ;;  %v647_v43 = vmul.f32 0.0078125, %v615_v55  ;;  %2662 = vmatpush3.bf16.msra.mxu1 %v3589_v35  ;;  %1175 = vmatprep.mubr.bf16.mxu1 %v3123_v4  ;;  %v716_v40 = vmul.f32 %v2864_v37, %v3500_v32  ;;  %v814_v57 = vadd.f32 %v3637_v22, %v776_v42 }
 0x1a8   : > { %v624_v44 = vmul.f32 0.0078125, %v569_v38  ;;  %2875 = vrsqrt.f32 %v678_v36  ;;  %2663 = vmatprep.subr.bf16.mxu1 %v2840_v39  ;;  %v3666_v45 = vpack.c.bf16 %v791_v46, %v790_v8  ;;  %v777_v49 = vmul.f32 %v3630_v29, %v739_v62  ;;  %v2843_v8 = vld [vmem:[#allocation5 + $0x68] ss:$12 sps:$4 sm:$0xff]  }
 0x1a9   : > { %v2866_v27 = vpop.eup %2865  ;;  %v679_v63 = vadd.f32 1e-05, %v647_v43  ;;  %v754_v47 = vmul.f32 %v3630_v29, %v716_v40 }
 0x1aa   : > { %v656_v52 = vadd.f32 1e-05, %v624_v44  ;;  %v2868_v53 = vpop.eup %2867  ;;  %v571_v56 = vpop.xlane.xlu1 %570  ;;  %1056 = vmatmul.mubr.bf16.gmra.mrb[4].mxu0 %v3666_v45  ;;  %v815_v58 = vadd.f32 %v3637_v22, %v777_v49  ;;  %v717_v60 = vmul.f32 %v2866_v27, %v3503_v6 }
 0x1ab   : > { %v573_v35 = vpop.xlane.xlu0 %572  ;;  %2877 = vrsqrt.f32 %v679_v63  ;;  %v625_v61 = vmul.f32 0.0078125, %v571_v56  ;;  %2664 = vmatpush3.bf16.msra.mxu1 %v2840_v39  ;;  %1065 = vmatprep.mubr.bf16.mxu0 %v3123_v4  ;;  %v740_v0 = vmul.f32 %v2868_v53, %v3510_v41  ;;  %v792_v34 = vadd.f32 %v3637_v22, %v754_v47 }
 0x1ac   : > { %v626_v32 = vmul.f32 0.0078125, %v573_v35  ;;  %2879 = vrsqrt.f32 %v656_v52  ;;  %2665 = vmatprep.subr.bf16.mxu1 %v2841_v48  ;;  %v3677_v30 = vpack.c.bf16 %v815_v58, %v814_v57  ;;  %v755_v2 = vmul.f32 %v3630_v29, %v717_v60  ;;  %v2844_v35 = vld [vmem:[#allocation5 + $0x80] ss:$12 sps:$4 sm:$0xff]  }
 0x1ad   : > { %v2870_v3 = vpop.eup %2869  ;;  %v657_v54 = vadd.f32 1e-05, %v625_v61  ;;  %v778_v37 = vmul.f32 %v3630_v29, %v740_v0 }
 0x1ae   : > { %v658_v6 = vadd.f32 1e-05, %v626_v32  ;;  %v2872_v5 = vpop.eup %2871  ;;  %v575_v7 = vpop.xlane.xlu1 %574  ;;  %1176 = vmatmul.mubr.bf16.gmra.mrb[4].mxu1 %v3677_v30  ;;  %v793_v36 = vadd.f32 %v3637_v22, %v755_v2  ;;  %v741_v41 = vmul.f32 %v2870_v3, %v3513_v9 }
 0x1af   : > { %v577_v39 = vpop.xlane.xlu0 %576  ;;  %2881 = vrsqrt.f32 %v657_v54  ;;  %v627_v55 = vmul.f32 0.0078125, %v575_v7  ;;  %2666 = vmatpush3.bf16.msra.mxu1 %v2841_v48  ;;  %1185 = vmatprep.mubr.bf16.mxu1 %v3123_v4  ;;  %v718_v62 = vmul.f32 %v2872_v5, %v3520_v10  ;;  %v816_v48 = vadd.f32 %v3637_v22, %v778_v37 }
 0x1b0   : > { %2883 = vrsqrt.f32 %v658_v6  ;;  %2667 = vmatprep.subr.bf16.mxu1 %v2842_v1  ;;  %v3686_v38 = vpack.c.bf16 %v793_v36, %v792_v34  ;;  %v779_v46 = vmul.f32 %v3630_v29, %v741_v41  ;;  %v628_v44 = vmul.f32 0.0078125, %v577_v39  ;;  %v2845_v6 = vld [vmem:[#allocation5 + $0x98] ss:$12 sps:$4 sm:$0xff]  }
 0x1b1   : > { %v2874_v42 = vpop.eup %2873  ;;  %v659_v43 = vadd.f32 1e-05, %v627_v55  ;;  %v756_v52 = vmul.f32 %v3630_v29, %v718_v62 }
 0x1b2   : > { %v2876_v9 = vpop.eup %2875  ;;  %v579_v49 = vpop.xlane.xlu1 %578  ;;  %1066 = vmatmul.mubr.bf16.gmra.mrb[8].mxu0 %v3686_v38  ;;  %v817_v27 = vadd.f32 %v3637_v22, %v779_v46  ;;  %v719_v63 = vmul.f32 %v2874_v42, %v3523_v11  ;;  %v660_v60 = vadd.f32 1e-05, %v628_v44  ;;  %v2846_v44 = vld [vmem:[#allocation5 + $0xb0] ss:$12 sps:$4 sm:$0xff]  }
 0x1b3   : > { %v581_v40 = vpop.xlane.xlu0 %580  ;;  %2885 = vrsqrt.f32 %v659_v43  ;;  %v629_v53 = vmul.f32 0.0078125, %v579_v49  ;;  %2668 = vmatpush3.bf16.msra.mxu1 %v2842_v1  ;;  %1075 = vmatprep.mubr.bf16.mxu0 %v3123_v4  ;;  %v742_v10 = vmul.f32 %v2876_v9, %v3530_v12  ;;  %v794_v0 = vadd.f32 %v3637_v22, %v756_v52 }
 0x1b4   : > { %2669 = vmatprep.subr.bf16.mxu1 %v2843_v8  ;;  %v3697_v56 = vpack.c.bf16 %v817_v27, %v816_v48  ;;  %v757_v57 = vmul.f32 %v3630_v29, %v719_v63  ;;  %v630_v34 = vmul.f32 0.0078125, %v581_v40 }
 0x1b5   : > { %v2878_v58 = vpop.eup %2877  ;;  %v661_v47 = vadd.f32 1e-05, %v629_v53  ;;  %v780_v2 = vmul.f32 %v3630_v29, %v742_v10 }
 0x1b6   : > { %v2880_v61 = vpop.eup %2879  ;;  %v583_v11 = vpop.xlane.xlu1 %582  ;;  %1186 = vmatmul.mubr.bf16.gmra.mrb[8].mxu1 %v3697_v56  ;;  %v795_v1 = vadd.f32 %v3637_v22, %v757_v57  ;;  %v743_v12 = vmul.f32 %v2878_v58, %v3533_v13  ;;  %v662_v40 = vadd.f32 1e-05, %v630_v34 }
 0x1b7   : > { %v585_v32 = vpop.xlane.xlu0 %584  ;;  %2887 = vrsqrt.f32 %v661_v47  ;;  %v631_v3 = vmul.f32 0.0078125, %v583_v11  ;;  %2670 = vmatpush3.bf16.msra.mxu1 %v2843_v8  ;;  %1195 = vmatprep.mubr.bf16.mxu1 %v3123_v4  ;;  %v720_v7 = vmul.f32 %v2880_v61, %v3540_v14  ;;  %v818_v37 = vadd.f32 %v3637_v22, %v780_v2 }
 0x1b8   : > { %2671 = vmatprep.subr.bf16.mxu1 %v2844_v35  ;;  %v3706_v54 = vpack.c.bf16 %v795_v1, %v794_v0  ;;  %v781_v5 = vmul.f32 %v3630_v29, %v743_v12  ;;  %2889 = vrsqrt.f32 %v660_v60  ;;  %v632_v48 = vmul.f32 0.0078125, %v585_v32 }
 0x1b9   : > { %v2882_v39 = vpop.eup %2881  ;;  %v758_v46 = vmul.f32 %v3630_v29, %v720_v7  ;;  %v663_v62 = vadd.f32 1e-05, %v631_v3 }
 0x1ba   : > { %v2884_v36 = vpop.eup %2883  ;;  %v587_v13 = vpop.xlane.xlu1 %586  ;;  %1076 = vmatmul.mubr.bf16.gmra.mrb[12].mxu0 %v3706_v54  ;;  %v819_v55 = vadd.f32 %v3637_v22, %v781_v5  ;;  %v721_v8 = vmul.f32 %v2882_v39, %v3543_v15  ;;  %v664_v0 = vadd.f32 1e-05, %v632_v48 }
 0x1bb   : > { %v589_v41 = vpop.xlane.xlu0 %588  ;;  %v633_v42 = vmul.f32 0.0078125, %v587_v13  ;;  %2672 = vmatpush3.bf16.msra.mxu1 %v2844_v35  ;;  %1085 = vmatprep.mubr.bf16.mxu0 %v3123_v4  ;;  %v722_v15 = vmul.f32 %v2884_v36, %v3550_v16  ;;  %v796_v10 = vadd.f32 %v3637_v22, %v758_v46  ;;  %2891 = vrsqrt.f32 %v663_v62 }
 0x1bc   : > { %v634_v14 = vmul.f32 0.0078125, %v589_v41  ;;  %2673 = vmatprep.subr.bf16.mxu1 %v2845_v6  ;;  %v3716_v43 = vpack.c.bf16 %v819_v55, %v818_v37  ;;  %v759_v9 = vmul.f32 %v3630_v29, %v721_v8 }
 0x1bd   : > { %v2886_v49 = vpop.eup %2885  ;;  %v665_v63 = vadd.f32 1e-05, %v633_v42  ;;  %v760_v12 = vmul.f32 %v3630_v29, %v722_v15 }
 0x1be   : > { %v666_v27 = vadd.f32 1e-05, %v634_v14  ;;  %v591_v52 = vpop.xlane.xlu1 %590  ;;  %1196 = vmatmul.mubr.bf16.gmra.mrb[12].mxu1 %v3716_v43  ;;  %v797_v35 = vadd.f32 %v3637_v22, %v759_v9  ;;  %v723_v57 = vmul.f32 %v2886_v49, %v3553_v17 }
 0x1bf   : > { %v593_v53 = vpop.xlane.xlu0 %592  ;;  %v635_v58 = vmul.f32 0.0078125, %v591_v52  ;;  %2674 = vmatpush3.bf16.msra.mxu1 %v2845_v6  ;;  %2677 = vmatprep.mubr.bf16.mxu1 %v3645_v50  ;;  %v798_v36 = vadd.f32 %v3637_v22, %v760_v12 }
 0x1c0   : > { %v636_v60 = vmul.f32 0.0078125, %v593_v53  ;;  %2893 = vrsqrt.f32 %v666_v27  ;;  %2675 = vmatprep.subr.bf16.mxu1 %v2846_v44  ;;  %v824_v16 = vpack.c.bf16 %v797_v35, %v796_v10  ;;  %v761_v47 = vmul.f32 %v3630_v29, %v723_v57 }
 0x1c1   : > { %v2888_v61 = vpop.eup %2887  ;;  %2895 = vrsqrt.f32 %v662_v40  ;;  %v667_v11 = vadd.f32 1e-05, %v635_v58 }
 0x1c2   : > { %v668_v32 = vadd.f32 1e-05, %v636_v60  ;;  %2897 = vrsqrt.f32 %v665_v63  ;;  %v595_v1 = vpop.xlane.xlu1 %594  ;;  %1086 = vmatmul.mubr.bf16.gmra.mrb[16].mxu0 %v824_v16  ;;  %v2890_v2 = vpop.eup %2889  ;;  %v799_v6 = vadd.f32 %v3637_v22, %v761_v47  ;;  %v725_v5 = vmul.f32 %v2888_v61, %v3563_v19 }
 0x1c3   : > { %v597_v17 = vpop.xlane.xlu0 %596  ;;  %2899 = vrsqrt.f32 %v667_v11  ;;  %v637_v3 = vmul.f32 0.0078125, %v595_v1  ;;  %2676 = vmatpush3.bf16.msra.mxu1 %v2846_v44  ;;  %1095 = vmatprep.mubr.bf16.mxu0 %v3123_v4  ;;  %v724_v13 = vmul.f32 %v2890_v2, %v3560_v18 }
 0x1c4   : > { %v638_v50 = vmul.f32 0.0078125, %v597_v17  ;;  %2901 = vrsqrt.f32 %v668_v32  ;;  %v825_v37 = vpack.c.bf16 %v799_v6, %v798_v36  ;;  %v763_v55 = vmul.f32 %v3630_v29, %v725_v5 }
 0x1c5   : > { %v669_v7 = vadd.f32 1e-05, %v637_v3  ;;  %2903 = vrsqrt.f32 %v664_v0  ;;  %v2892_v8 = vpop.eup %2891  ;;  %v762_v62 = vmul.f32 %v3630_v29, %v724_v13 }
 0x1c6   : > { %v670_v39 = vadd.f32 1e-05, %v638_v50  ;;  %v599_v34 = vpop.xlane.xlu1 %598  ;;  %2678 = vmatmul.mubr.bf16.vlgmr.msra.gmra.mrb[16].mxu1 %v3666_v45  ;;  %v801_v14 = vadd.f32 %v3637_v22, %v763_v55 }
 0x1c7   : > { %2905 = vrsqrt.f32 %v669_v7  ;;  %v639_v41 = vmul.f32 0.0078125, %v599_v34  ;;  %2681 = vmatprep.mubr.bf16.mxu1 %v3686_v38  ;;  %v727_v38 = vmul.f32 %v2892_v8, %v3573_v21  ;;  %v800_v40 = vadd.f32 %v3637_v22, %v762_v62 }
 0x1c8   : > { %2907 = vrsqrt.f32 %v670_v39 }
 0x1c9   : > { %v671_v19 = vadd.f32 1e-05, %v639_v41  ;;  %v826_v52 = vpack.c.bf16 %v801_v14, %v800_v40  ;;  %v765_v21 = vmul.f32 %v3630_v29, %v727_v38 }
 0x1ca   : > { %v2894_v46 = vpop.eup %2893  ;;  %1096 = vmatmul.mubr.bf16.gmra.mrb[20].mxu0 %v825_v37 }
 0x1cb   : > { %v2896_v42 = vpop.eup %2895  ;;  %2909 = vrsqrt.f32 %v671_v19  ;;  %1105 = vmatprep.mubr.bf16.mxu0 %v3123_v4  ;;  %v730_v18 = vmul.f32 %v2894_v46, %v3595_v24 }
 0x1cc   : > { %v2898_v45 = vpop.eup %2897  ;;  %v726_v48 = vmul.f32 %v2896_v42, %v3570_v20 }
 0x1cd   : > { %v2900_v44 = vpop.eup %2899  ;;  %v768_v9 = vmul.f32 %v3630_v29, %v730_v18 }
 0x1ce   : > { %v2902_v49 = vpop.eup %2901  ;;  %2682 = vmatmul.mubr.bf16.gmra.mrb[20].mxu1 %v3706_v54  ;;  %v731_v27 = vmul.f32 %v2900_v44, %v3598_v25  ;;  %v729_v54 = vmul.f32 %v2898_v45, %v3585_v23  ;;  %v764_v20 = vmul.f32 %v3630_v29, %v726_v48  ;;  %v803_v23 = vadd.f32 %v3637_v22, %v765_v21 }
 0x1cf   : > { %2685 = vmatprep.mubr.bf16.mxu1 %v824_v16  ;;  %v806_v24 = vadd.f32 %v3637_v22, %v768_v9  ;;  %v732_v15 = vmul.f32 %v2902_v49, %v3605_v51  ;;  %v2904_v63 = vpop.eup %2903 }
 0x1d0   : > { %v769_v53 = vmul.f32 %v3630_v29, %v731_v27  ;;  %v728_v51 = vmul.f32 %v2904_v63, %v3582_v33  ;;  %v767_v32 = vmul.f32 %v3630_v29, %v729_v54 }
 0x1d1   : > { %v2906_v10 = vpop.eup %2905  ;;  %v770_v35 = vmul.f32 %v3630_v29, %v732_v15 }
 0x1d2   : > { %v2908_v57 = vpop.eup %2907  ;;  %1106 = vmatmul.mubr.bf16.gmra.mrb[24].mxu0 %v826_v52  ;;  %v807_v25 = vadd.f32 %v3637_v22, %v769_v53  ;;  %v733_v58 = vmul.f32 %v2906_v10, %v3608_v26  ;;  %v802_v26 = vadd.f32 %v3637_v22, %v764_v20  ;;  %v805_v50 = vadd.f32 %v3637_v22, %v767_v32 }
 0x1d3   : > { %1115 = vmatprep.mubr.bf16.mxu0 %v3123_v4  ;;  %v808_v60 = vadd.f32 %v3637_v22, %v770_v35  ;;  %v734_v16 = vmul.f32 %v2908_v57, %v3615_v59  ;;  %v766_v59 = vmul.f32 %v3630_v29, %v728_v51 }
 0x1d4   : > { %v829_v47 = vpack.c.bf16 %v807_v25, %v806_v24  ;;  %v771_v61 = vmul.f32 %v3630_v29, %v733_v58  ;;  %v827_v12 = vpack.c.bf16 %v803_v23, %v802_v26 }
 0x1d5   : > { %v2910_v11 = vpop.eup %2909  ;;  %v772_v0 = vmul.f32 %v3630_v29, %v734_v16  ;;  %v804_v5 = vadd.f32 %v3637_v22, %v766_v59 }
 0x1d6   : > { %2686 = vmatmul.mubr.bf16.gmra.mrb[24].mxu1 %v825_v37  ;;  %v809_v1 = vadd.f32 %v3637_v22, %v771_v61  ;;  %v735_v33 = vmul.f32 %v2910_v11, %v3618_v28 }
 0x1d7   : > { %2689 = vmatprep.mubr.bf16.mxu1 %v826_v52  ;;  %v810_v17 = vadd.f32 %v3637_v22, %v772_v0  ;;  %v828_v28 = vpack.c.bf16 %v805_v50, %v804_v5 }
 0x1d8   : > { %v830_v2 = vpack.c.bf16 %v809_v1, %v808_v60  ;;  %v773_v3 = vmul.f32 %v3630_v29, %v735_v33  ;;  %v870_v29 = vlaneseq }
 0x1da   : > { %1116 = vmatmul.mubr.bf16.gmra.mrb[28].mxu0 %v827_v12  ;;  %v811_v6 = vadd.f32 %v3637_v22, %v773_v3  ;;  %v3779_v22 = vshrl.u32 %v870_v29, 7 }
 0x1db   : > { %1125 = vmatprep.mubr.bf16.mxu0 %v3123_v4 }
 0x1dc   : > { %v831_v7 = vpack.c.bf16 %v811_v6, %v810_v17  ;;  %v872_v39 = vsub.s32 0, %v3779_v22  ;;  %v876_v34 = vsub.s32 1, %v3779_v22 }
 0x1de   : > { %2690 = vmatmul.mubr.bf16.gmra.mrb[28].mxu1 %v827_v12 }
 0x1df   : > { %2693 = vmatprep.mubr.bf16.mxu1 %v828_v28 }
 0x1e2   : > { %1126 = vmatmul.mubr.bf16.gmra.mrb[32].mxu0 %v828_v28 }
 0x1e3   : > { %1135 = vmatprep.mubr.bf16.mxu0 %v3123_v4 }
 0x1e6   : > { %2694 = vmatmul.mubr.bf16.gmra.mrb[32].mxu1 %v829_v47 }
 0x1e7   : > { %2697 = vmatprep.mubr.bf16.mxu1 %v830_v2 }
 0x1ea   : > { %1136 = vmatmul.mubr.bf16.gmra.mrb[36].mxu0 %v829_v47 }
 0x1eb   : > { %1145 = vmatprep.mubr.bf16.mxu0 %v3123_v4 }
 0x1ee   : > { %2698 = vmatmul.mubr.bf16.gmra.mrb[36].mxu1 %v831_v7 }
 0x1ef   : > { %2701 = vmatprep.mubr.bf16.mxu1 %v3656_v31  ;;  %v3785_v31 = vld [vmem:[%s4102_s4] sm:$0x7] }
 0x1f2   : > { %1146 = vmatmul.mubr.bf16.gmra.mrb[40].mxu0 %v830_v2 }
 0x1f3   : > { %1155 = vmatprep.mubr.bf16.mxu0 %v3123_v4  ;;  %v3789_v4 = vrot.slane %v3785_v31, %v872_v39 }
 0x1f6   : > { %2702 = vmatmul.mubr.bf16.gmra.mrb[40].mxu1 %v3677_v30 }
 0x1f7   : > { %2705 = vmatprep.mubr.bf16.mxu1 %v3697_v56  ;;  %v3792_v56 = vrot.slane %v3785_v31, %v876_v34 }
 0x1fa   : > { %1156 = vmatmul.mubr.bf16.gmra.mrb[44].mxu0 %v831_v7 }
 0x1fe   : > { %2706 = vmatmul.mubr.bf16.gmra.mrb[44].mxu1 %v3716_v43 }
 0x275   : > { %v1047_v30 = vpop.f32.mrb[0].mxu0 }
 0x276   : > { %v1048_v43 = vadd.f32 %v1047_v30, %v3789_v4  ;;  %v1049_v36 = vpop.f32.mrb[1].mxu0 }
 0x277   : > { %v1051_v13 = vpop.f32.mrb[2].mxu0  ;;  %v1050_v55 = vadd.f32 %v1049_v36, %v3792_v56 }
 0x278   : > { %v1052_v41 = vadd.f32 %v1051_v13, %v3789_v4  ;;  %v1053_v37 = vpop.f32.mrb[3].mxu0  ;;  %v1367_v46 = vmul.f32 0.17677669, %v1048_v43 }
 0x279   : > { %v1054_v8 = vadd.f32 %v1053_v37, %v3792_v56  ;;  %v1167_v19 = vpop.f32.mrb[0].mxu1 }
 0x27a   : > { %v1368_v62 = vmul.f32 0.17677669, %v1052_v41  ;;  %v1168_v42 = vadd.f32 %v1167_v19, %v3789_v4  ;;  %v1169_v18 = vpop.f32.mrb[1].mxu1 }
 0x27b   : > { %v2435_v45 = vpack.c.bf16 %v1054_v8, %v1050_v55  ;;  %v1171_v14 = vpop.f32.mrb[2].mxu1  ;;  %v1170_v49 = vadd.f32 %v1169_v18, %v3792_v56 }
 0x27c   : > { %v2355_v38 = vpack.c.bf16 %v1368_v62, %v1367_v46  ;;  %v1172_v44 = vadd.f32 %v1171_v14, %v3789_v4  ;;  %v1173_v9 = vpop.f32.mrb[3].mxu1  ;;  %v1391_v27 = vmul.f32 0.17677669, %v1168_v42 }
 0x27d   : > { %2436 = vst [vmem:[%s3804_s16] sm:$0xff] %v2435_v45   ;;  %v1174_v40 = vadd.f32 %v1173_v9, %v3792_v56  ;;  %v1057_v48 = vpop.f32.mrb[4].mxu0 }
 0x27e   : > { %2356 = vst [vmem:[%s3810_s20] sm:$0xff] %v2355_v38   ;;  %v1392_v24 = vmul.f32 0.17677669, %v1172_v44  ;;  %v1058_v15 = vadd.f32 %v1057_v48, %v3789_v4  ;;  %v1059_v63 = vpop.f32.mrb[5].mxu0 }
 0x27f   : > { %v2495_v52 = vpack.c.bf16 %v1174_v40, %v1170_v49  ;;  %v1061_v21 = vpop.f32.mrb[6].mxu0  ;;  %v1060_v35 = vadd.f32 %v1059_v63, %v3792_v56 }
 0x280   : > { %v2415_v53 = vpack.c.bf16 %v1392_v24, %v1391_v27  ;;  %v1062_v10 = vadd.f32 %v1061_v21, %v3789_v4  ;;  %v1063_v54 = vpop.f32.mrb[7].mxu0  ;;  %v1369_v25 = vmul.f32 0.17677669, %v1058_v15 }
 0x281   : > { %2618 = vst [vmem:[%s3804_s16 + $0x60] sm:$0xff] %v2495_v52   ;;  %v1064_v57 = vadd.f32 %v1063_v54, %v3792_v56  ;;  %v1177_v20 = vpop.f32.mrb[4].mxu1 }
 0x282   : > { %2603 = vst [vmem:[%s3810_s20 + $0x60] sm:$0xff] %v2415_v53   ;;  %v1370_v58 = vmul.f32 0.17677669, %v1062_v10  ;;  %v1178_v51 = vadd.f32 %v1177_v20, %v3789_v4  ;;  %v1179_v60 = vpop.f32.mrb[5].mxu1 }
 0x283   : > { %v2440_v16 = vpack.c.bf16 %v1064_v57, %v1060_v35  ;;  %v1181_v23 = vpop.f32.mrb[6].mxu1  ;;  %v1180_v32 = vadd.f32 %v1179_v60, %v3792_v56  ;;  %v880_v35 = vsub.s32 2, %v3779_v22 }
 0x284   : > { %v2360_v47 = vpack.c.bf16 %v1370_v58, %v1369_v25  ;;  %v1182_v61 = vadd.f32 %v1181_v23, %v3789_v4  ;;  %v1183_v11 = vpop.f32.mrb[7].mxu1  ;;  %v1393_v1 = vmul.f32 0.17677669, %v1178_v51 }
 0x285   : > { %2607 = vst [vmem:[%s3804_s16 + $0x8] sm:$0xff] %v2440_v16   ;;  %v1184_v0 = vadd.f32 %v1183_v11, %v3792_v56  ;;  %v1067_v26 = vpop.f32.mrb[8].mxu0 }
 0x286   : > { %2592 = vst [vmem:[%s3810_s20 + $0x8] sm:$0xff] %v2360_v47   ;;  %v1394_v33 = vmul.f32 0.17677669, %v1182_v61  ;;  %v1068_v59 = vadd.f32 %v1067_v26, %v3789_v4  ;;  %v1069_v17 = vpop.f32.mrb[9].mxu0 }
 0x287   : > { %v2500_v12 = vpack.c.bf16 %v1184_v0, %v1180_v32  ;;  %v1071_v2 = vpop.f32.mrb[10].mxu0  ;;  %v1070_v5 = vadd.f32 %v1069_v17, %v3792_v56  ;;  %v3853_v32 = vrot.slane %v3785_v31, %v880_v35 }
 0x288   : > { %v2420_v3 = vpack.c.bf16 %v1394_v33, %v1393_v1  ;;  %v1072_v50 = vadd.f32 %v1071_v2, %v3789_v4  ;;  %v1073_v6 = vpop.f32.mrb[11].mxu0  ;;  %v1371_v29 = vmul.f32 0.17677669, %v1068_v59 }
 0x289   : > { %2619 = vst [vmem:[%s3804_s16 + $0x68] sm:$0xff] %v2500_v12   ;;  %v1074_v7 = vadd.f32 %v1073_v6, %v3792_v56  ;;  %v1187_v28 = vpop.f32.mrb[8].mxu1 }
 0x28a   : > { %2604 = vst [vmem:[%s3810_s20 + $0x68] sm:$0xff] %v2420_v3   ;;  %v1372_v39 = vmul.f32 0.17677669, %v1072_v50  ;;  %v1188_v34 = vadd.f32 %v1187_v28, %v3789_v4  ;;  %v1189_v30 = vpop.f32.mrb[9].mxu1 }
 0x28b   : > { %v2445_v43 = vpack.c.bf16 %v1074_v7, %v1070_v5  ;;  %v1191_v36 = vpop.f32.mrb[10].mxu1  ;;  %v1190_v55 = vadd.f32 %v1189_v30, %v3792_v56 }
 0x28c   : > { %v2365_v13 = vpack.c.bf16 %v1372_v39, %v1371_v29  ;;  %v1192_v41 = vadd.f32 %v1191_v36, %v3789_v4  ;;  %v1193_v37 = vpop.f32.mrb[11].mxu1  ;;  %v1395_v46 = vmul.f32 0.17677669, %v1188_v34 }
 0x28d   : > { %2608 = vst [vmem:[%s3804_s16 + $0x10] sm:$0xff] %v2445_v43   ;;  %v1194_v8 = vadd.f32 %v1193_v37, %v3792_v56  ;;  %v1077_v19 = vpop.f32.mrb[12].mxu0 }
 0x28e   : > { %2593 = vst [vmem:[%s3810_s20 + $0x10] sm:$0xff] %v2365_v13   ;;  %v1396_v62 = vmul.f32 0.17677669, %v1192_v41  ;;  %v1078_v42 = vadd.f32 %v1077_v19, %v3789_v4  ;;  %v1079_v18 = vpop.f32.mrb[13].mxu0 }
 0x28f   : > { %v2505_v45 = vpack.c.bf16 %v1194_v8, %v1190_v55  ;;  %v1081_v14 = vpop.f32.mrb[14].mxu0  ;;  %v1080_v49 = vadd.f32 %v1079_v18, %v3792_v56 }
 0x290   : > { %v2425_v38 = vpack.c.bf16 %v1396_v62, %v1395_v46  ;;  %v1082_v44 = vadd.f32 %v1081_v14, %v3789_v4  ;;  %v1083_v9 = vpop.f32.mrb[15].mxu0  ;;  %v1373_v27 = vmul.f32 0.17677669, %v1078_v42 }
 0x291   : > { %2620 = vst [vmem:[%s3804_s16 + $0x70] sm:$0xff] %v2505_v45   ;;  %v1084_v40 = vadd.f32 %v1083_v9, %v3792_v56  ;;  %v1197_v48 = vpop.f32.mrb[12].mxu1 }
 0x292   : > { %2605 = vst [vmem:[%s3810_s20 + $0x70] sm:$0xff] %v2425_v38   ;;  %v1374_v24 = vmul.f32 0.17677669, %v1082_v44  ;;  %v1198_v15 = vadd.f32 %v1197_v48, %v3789_v4  ;;  %v1199_v63 = vpop.f32.mrb[13].mxu1 }
 0x293   : > { %v2450_v52 = vpack.c.bf16 %v1084_v40, %v1080_v49  ;;  %v1201_v21 = vpop.f32.mrb[14].mxu1  ;;  %v1200_v57 = vadd.f32 %v1199_v63, %v3792_v56 }
 0x294   : > { %v2370_v53 = vpack.c.bf16 %v1374_v24, %v1373_v27  ;;  %v1202_v10 = vadd.f32 %v1201_v21, %v3789_v4  ;;  %v1203_v54 = vpop.f32.mrb[15].mxu1  ;;  %v1397_v58 = vmul.f32 0.17677669, %v1198_v15 }
 0x295   : > { %2609 = vst [vmem:[%s3804_s16 + $0x18] sm:$0xff] %v2450_v52   ;;  %v1204_v20 = vadd.f32 %v1203_v54, %v3792_v56  ;;  %v1087_v25 = vpop.f32.mrb[16].mxu0 }
 0x296   : > { %2594 = vst [vmem:[%s3810_s20 + $0x18] sm:$0xff] %v2370_v53   ;;  %v1398_v51 = vmul.f32 0.17677669, %v1202_v10  ;;  %v1088_v60 = vadd.f32 %v1087_v25, %v3789_v4  ;;  %v1089_v16 = vpop.f32.mrb[17].mxu0 }
 0x297   : > { %v2510_v23 = vpack.c.bf16 %v1204_v20, %v1200_v57  ;;  %v1091_v47 = vpop.f32.mrb[18].mxu0  ;;  %v1090_v0 = vadd.f32 %v1089_v16, %v3792_v56 }
 0x298   : > { %v2430_v61 = vpack.c.bf16 %v1398_v51, %v1397_v58  ;;  %v1092_v11 = vadd.f32 %v1091_v47, %v3789_v4  ;;  %v1093_v22 = vpop.f32.mrb[19].mxu0  ;;  %v1375_v33 = vmul.f32 0.17677669, %v1088_v60 }
 0x299   : > { %2621 = vst [vmem:[%s3804_s16 + $0x78] sm:$0xff] %v2510_v23   ;;  %v1094_v26 = vadd.f32 %v1093_v22, %v3792_v56  ;;  %v2679_v1 = vpop.f32.mrb[16].mxu1 }
 0x29a   : > { %2606 = vst [vmem:[%s3810_s20 + $0x78] sm:$0xff] %v2430_v61   ;;  %v1376_v59 = vmul.f32 0.17677669, %v1092_v11  ;;  %v1240_v17 = vpop.f32.mrb[17].mxu1  ;;  %v1249_v50 = vadd.f32 %v2679_v1, %v3853_v32 }
 0x29b   : > { %v2455_v12 = vpack.c.bf16 %v1094_v26, %v1090_v0  ;;  %v2680_v2 = vpop.f32.mrb[18].mxu1  ;;  %v1241_v5 = vadd.f32 %v1240_v17, %v3853_v32 }
 0x29c   : > { %v2375_v3 = vpack.c.bf16 %v1376_v59, %v1375_v33  ;;  %v1252_v31 = vadd.f32 %v2680_v2, %v3853_v32  ;;  %v1243_v6 = vpop.f32.mrb[19].mxu1 }
 0x29d   : > { %2610 = vst [vmem:[%s3804_s16 + $0x20] sm:$0xff] %v2455_v12   ;;  %v1244_v7 = vadd.f32 %v1243_v6, %v3853_v32  ;;  %v1097_v28 = vpop.f32.mrb[20].mxu0 }
 0x29e   : > { %2595 = vst [vmem:[%s3810_s20 + $0x20] sm:$0xff] %v2375_v3   ;;  %v2520_v29 = vpack.c.bf16 %v1252_v31, %v1249_v50  ;;  %v1098_v39 = vadd.f32 %v1097_v28, %v3789_v4  ;;  %v1099_v34 = vpop.f32.mrb[21].mxu0 }
 0x29f   : > { %v2515_v30 = vpack.c.bf16 %v1244_v7, %v1241_v5  ;;  %v1101_v43 = vpop.f32.mrb[22].mxu0  ;;  %v1100_v41 = vadd.f32 %v1099_v34, %v3792_v56 }
 0x2a0   : > { %2622 = vst [vmem:[%s3867_s13 + $0x8] sm:$0xff] %v2520_v29   ;;  %v1102_v36 = vadd.f32 %v1101_v43, %v3789_v4  ;;  %v1103_v13 = vpop.f32.mrb[23].mxu0  ;;  %v1377_v8 = vmul.f32 0.17677669, %v1098_v39 }
 0x2a1   : > { %2516 = vst [vmem:[%s3867_s13] sm:$0xff] %v2515_v30   ;;  %v1104_v37 = vadd.f32 %v1103_v13, %v3792_v56  ;;  %v2683_v55 = vpop.f32.mrb[20].mxu1 }
 0x2a2   : > { %v1378_v19 = vmul.f32 0.17677669, %v1102_v36  ;;  %v1256_v46 = vpop.f32.mrb[21].mxu1  ;;  %v1265_v45 = vadd.f32 %v2683_v55, %v3853_v32 }
 0x2a3   : > { %v2460_v62 = vpack.c.bf16 %v1104_v37, %v1100_v41  ;;  %v2684_v42 = vpop.f32.mrb[22].mxu1  ;;  %v1257_v44 = vadd.f32 %v1256_v46, %v3853_v32 }
 0x2a4   : > { %v2380_v18 = vpack.c.bf16 %v1378_v19, %v1377_v8  ;;  %v1268_v14 = vadd.f32 %v2684_v42, %v3853_v32  ;;  %v1259_v38 = vpop.f32.mrb[23].mxu1 }
 0x2a5   : > { %2611 = vst [vmem:[%s3804_s16 + $0x28] sm:$0xff] %v2460_v62   ;;  %v1260_v9 = vadd.f32 %v1259_v38, %v3853_v32  ;;  %v1107_v49 = vpop.f32.mrb[24].mxu0 }
 0x2a6   : > { %2596 = vst [vmem:[%s3810_s20 + $0x28] sm:$0xff] %v2380_v18   ;;  %v2530_v40 = vpack.c.bf16 %v1268_v14, %v1265_v45  ;;  %v1108_v48 = vadd.f32 %v1107_v49, %v3789_v4  ;;  %v1109_v27 = vpop.f32.mrb[25].mxu0 }
 0x2a7   : > { %v2525_v24 = vpack.c.bf16 %v1260_v9, %v1257_v44  ;;  %v1111_v15 = vpop.f32.mrb[26].mxu0  ;;  %v1110_v21 = vadd.f32 %v1109_v27, %v3792_v56 }
 0x2a8   : > { %2624 = vst [vmem:[%s3867_s13 + $0x18] sm:$0xff] %v2530_v40   ;;  %v1112_v63 = vadd.f32 %v1111_v15, %v3789_v4  ;;  %v1113_v52 = vpop.f32.mrb[27].mxu0  ;;  %v1379_v54 = vmul.f32 0.17677669, %v1108_v48 }
 0x2a9   : > { %2623 = vst [vmem:[%s3867_s13 + $0x10] sm:$0xff] %v2525_v24   ;;  %v1114_v53 = vadd.f32 %v1113_v52, %v3792_v56  ;;  %v2687_v10 = vpop.f32.mrb[24].mxu1 }
 0x2aa   : > { %v1380_v35 = vmul.f32 0.17677669, %v1112_v63  ;;  %v1272_v57 = vpop.f32.mrb[25].mxu1  ;;  %v1281_v51 = vadd.f32 %v2687_v10, %v3853_v32 }
 0x2ab   : > { %v2465_v20 = vpack.c.bf16 %v1114_v53, %v1110_v21  ;;  %v2688_v25 = vpop.f32.mrb[26].mxu1  ;;  %v1273_v23 = vadd.f32 %v1272_v57, %v3853_v32 }
 0x2ac   : > { %v2385_v58 = vpack.c.bf16 %v1380_v35, %v1379_v54  ;;  %v1284_v60 = vadd.f32 %v2688_v25, %v3853_v32  ;;  %v1275_v16 = vpop.f32.mrb[27].mxu1 }
 0x2ad   : > { %2612 = vst [vmem:[%s3804_s16 + $0x30] sm:$0xff] %v2465_v20   ;;  %v1276_v47 = vadd.f32 %v1275_v16, %v3853_v32  ;;  %v1117_v61 = vpop.f32.mrb[28].mxu0 }
 0x2ae   : > { %2597 = vst [vmem:[%s3810_s20 + $0x30] sm:$0xff] %v2385_v58   ;;  %v2540_v11 = vpack.c.bf16 %v1284_v60, %v1281_v51  ;;  %v1118_v22 = vadd.f32 %v1117_v61, %v3789_v4  ;;  %v1119_v0 = vpop.f32.mrb[29].mxu0 }
 0x2af   : > { %v2535_v26 = vpack.c.bf16 %v1276_v47, %v1273_v23  ;;  %v1121_v1 = vpop.f32.mrb[30].mxu0  ;;  %v1120_v17 = vadd.f32 %v1119_v0, %v3792_v56 }
 0x2b0   : > { %2626 = vst [vmem:[%s3867_s13 + $0x28] sm:$0xff] %v2540_v11   ;;  %v1122_v33 = vadd.f32 %v1121_v1, %v3789_v4  ;;  %v1123_v59 = vpop.f32.mrb[31].mxu0  ;;  %v1381_v3 = vmul.f32 0.17677669, %v1118_v22 }
 0x2b1   : > { %2625 = vst [vmem:[%s3867_s13 + $0x20] sm:$0xff] %v2535_v26   ;;  %v1124_v12 = vadd.f32 %v1123_v59, %v3792_v56  ;;  %v2691_v2 = vpop.f32.mrb[28].mxu1 }
 0x2b2   : > { %v1382_v50 = vmul.f32 0.17677669, %v1122_v33  ;;  %v1288_v31 = vpop.f32.mrb[29].mxu1  ;;  %v1297_v28 = vadd.f32 %v2691_v2, %v3853_v32 }
 0x2b3   : > { %v2470_v6 = vpack.c.bf16 %v1124_v12, %v1120_v17  ;;  %v2692_v5 = vpop.f32.mrb[30].mxu1  ;;  %v1289_v34 = vadd.f32 %v1288_v31, %v3853_v32 }
 0x2b4   : > { %v2390_v7 = vpack.c.bf16 %v1382_v50, %v1381_v3  ;;  %v1300_v29 = vadd.f32 %v2692_v5, %v3853_v32  ;;  %v1291_v39 = vpop.f32.mrb[31].mxu1 }
 0x2b5   : > { %2613 = vst [vmem:[%s3804_s16 + $0x38] sm:$0xff] %v2470_v6   ;;  %v1292_v30 = vadd.f32 %v1291_v39, %v3853_v32  ;;  %v1127_v43 = vpop.f32.mrb[32].mxu0 }
 0x2b6   : > { %2598 = vst [vmem:[%s3810_s20 + $0x38] sm:$0xff] %v2390_v7   ;;  %v2550_v36 = vpack.c.bf16 %v1300_v29, %v1297_v28  ;;  %v1128_v13 = vadd.f32 %v1127_v43, %v3789_v4  ;;  %v1129_v41 = vpop.f32.mrb[33].mxu0 }
 0x2b7   : > { %v2545_v37 = vpack.c.bf16 %v1292_v30, %v1289_v34  ;;  %v1131_v55 = vpop.f32.mrb[34].mxu0  ;;  %v1130_v46 = vadd.f32 %v1129_v41, %v3792_v56 }
 0x2b8   : > { %2628 = vst [vmem:[%s3867_s13 + $0x38] sm:$0xff] %v2550_v36   ;;  %v1132_v8 = vadd.f32 %v1131_v55, %v3789_v4  ;;  %v1133_v19 = vpop.f32.mrb[35].mxu0  ;;  %v1383_v18 = vmul.f32 0.17677669, %v1128_v13 }
 0x2b9   : > { %2627 = vst [vmem:[%s3867_s13 + $0x30] sm:$0xff] %v2545_v37   ;;  %v1134_v62 = vadd.f32 %v1133_v19, %v3792_v56  ;;  %v2695_v42 = vpop.f32.mrb[32].mxu1 }
 0x2ba   : > { %v1384_v45 = vmul.f32 0.17677669, %v1132_v8  ;;  %v1304_v14 = vpop.f32.mrb[33].mxu1  ;;  %v1313_v49 = vadd.f32 %v2695_v42, %v3853_v32 }
 0x2bb   : > { %v2475_v38 = vpack.c.bf16 %v1134_v62, %v1130_v46  ;;  %v2696_v44 = vpop.f32.mrb[34].mxu1  ;;  %v1305_v27 = vadd.f32 %v1304_v14, %v3853_v32 }
 0x2bc   : > { %v2395_v9 = vpack.c.bf16 %v1384_v45, %v1383_v18  ;;  %v1316_v40 = vadd.f32 %v2696_v44, %v3853_v32  ;;  %v1307_v48 = vpop.f32.mrb[35].mxu1 }
 0x2bd   : > { %2614 = vst [vmem:[%s3804_s16 + $0x40] sm:$0xff] %v2475_v38   ;;  %v1308_v24 = vadd.f32 %v1307_v48, %v3853_v32  ;;  %v1137_v15 = vpop.f32.mrb[36].mxu0 }
 0x2be   : > { %2599 = vst [vmem:[%s3810_s20 + $0x40] sm:$0xff] %v2395_v9   ;;  %v2560_v63 = vpack.c.bf16 %v1316_v40, %v1313_v49  ;;  %v1138_v52 = vadd.f32 %v1137_v15, %v3789_v4  ;;  %v1139_v21 = vpop.f32.mrb[37].mxu0 }
 0x2bf   : > { %v2555_v53 = vpack.c.bf16 %v1308_v24, %v1305_v27  ;;  %v1141_v10 = vpop.f32.mrb[38].mxu0  ;;  %v1140_v57 = vadd.f32 %v1139_v21, %v3792_v56 }
 0x2c0   : > { %2630 = vst [vmem:[%s3867_s13 + $0x48] sm:$0xff] %v2560_v63   ;;  %v1142_v54 = vadd.f32 %v1141_v10, %v3789_v4  ;;  %v1143_v35 = vpop.f32.mrb[39].mxu0  ;;  %v1385_v58 = vmul.f32 0.17677669, %v1138_v52 }
 0x2c1   : > { %2629 = vst [vmem:[%s3867_s13 + $0x40] sm:$0xff] %v2555_v53   ;;  %v1144_v20 = vadd.f32 %v1143_v35, %v3792_v56  ;;  %v2699_v25 = vpop.f32.mrb[36].mxu1 }
 0x2c2   : > { %v1386_v51 = vmul.f32 0.17677669, %v1142_v54  ;;  %v1320_v60 = vpop.f32.mrb[37].mxu1  ;;  %v1329_v61 = vadd.f32 %v2699_v25, %v3853_v32 }
 0x2c3   : > { %v2480_v16 = vpack.c.bf16 %v1144_v20, %v1140_v57  ;;  %v2700_v23 = vpop.f32.mrb[38].mxu1  ;;  %v1321_v0 = vadd.f32 %v1320_v60, %v3853_v32 }
 0x2c4   : > { %v2400_v47 = vpack.c.bf16 %v1386_v51, %v1385_v58  ;;  %v1332_v11 = vadd.f32 %v2700_v23, %v3853_v32  ;;  %v1323_v22 = vpop.f32.mrb[39].mxu1 }
 0x2c5   : > { %2615 = vst [vmem:[%s3804_s16 + $0x48] sm:$0xff] %v2480_v16   ;;  %v1324_v26 = vadd.f32 %v1323_v22, %v3853_v32  ;;  %v1147_v1 = vpop.f32.mrb[40].mxu0 }
 0x2c6   : > { %2600 = vst [vmem:[%s3810_s20 + $0x48] sm:$0xff] %v2400_v47   ;;  %v2570_v33 = vpack.c.bf16 %v1332_v11, %v1329_v61  ;;  %v1148_v59 = vadd.f32 %v1147_v1, %v3789_v4  ;;  %v1149_v17 = vpop.f32.mrb[41].mxu0 }
 0x2c7   : > { %v2565_v12 = vpack.c.bf16 %v1324_v26, %v1321_v0  ;;  %v1151_v2 = vpop.f32.mrb[42].mxu0  ;;  %v1150_v31 = vadd.f32 %v1149_v17, %v3792_v56 }
 0x2c8   : > { %2632 = vst [vmem:[%s3867_s13 + $0x58] sm:$0xff] %v2570_v33   ;;  %v1152_v3 = vadd.f32 %v1151_v2, %v3789_v4  ;;  %v1153_v50 = vpop.f32.mrb[43].mxu0  ;;  %v1387_v7 = vmul.f32 0.17677669, %v1148_v59 }
 0x2c9   : > { %2631 = vst [vmem:[%s3867_s13 + $0x50] sm:$0xff] %v2565_v12   ;;  %v1154_v6 = vadd.f32 %v1153_v50, %v3792_v56  ;;  %v2703_v5 = vpop.f32.mrb[40].mxu1 }
 0x2ca   : > { %v1388_v28 = vmul.f32 0.17677669, %v1152_v3  ;;  %v1336_v29 = vpop.f32.mrb[41].mxu1  ;;  %v1345_v43 = vadd.f32 %v2703_v5, %v3853_v32 }
 0x2cb   : > { %v2485_v39 = vpack.c.bf16 %v1154_v6, %v1150_v31  ;;  %v2704_v34 = vpop.f32.mrb[42].mxu1  ;;  %v1337_v41 = vadd.f32 %v1336_v29, %v3853_v32 }
 0x2cc   : > { %v2405_v30 = vpack.c.bf16 %v1388_v28, %v1387_v7  ;;  %v1348_v36 = vadd.f32 %v2704_v34, %v3853_v32  ;;  %v1339_v13 = vpop.f32.mrb[43].mxu1 }
 0x2cd   : > { %2616 = vst [vmem:[%s3804_s16 + $0x50] sm:$0xff] %v2485_v39   ;;  %v1340_v37 = vadd.f32 %v1339_v13, %v3853_v32  ;;  %v1157_v55 = vpop.f32.mrb[44].mxu0 }
 0x2ce   : > { %2601 = vst [vmem:[%s3810_s20 + $0x50] sm:$0xff] %v2405_v30   ;;  %v2580_v8 = vpack.c.bf16 %v1348_v36, %v1345_v43  ;;  %v1158_v19 = vadd.f32 %v1157_v55, %v3789_v4  ;;  %v1159_v46 = vpop.f32.mrb[45].mxu0 }
 0x2cf   : > { %v2575_v62 = vpack.c.bf16 %v1340_v37, %v1337_v41  ;;  %v1161_v42 = vpop.f32.mrb[46].mxu0  ;;  %v1160_v14 = vadd.f32 %v1159_v46, %v3792_v56 }
 0x2d0   : > { %2634 = vst [vmem:[%s3867_s13 + $0x68] sm:$0xff] %v2580_v8   ;;  %v1162_v18 = vadd.f32 %v1161_v42, %v3789_v4  ;;  %v1163_v45 = vpop.f32.mrb[47].mxu0  ;;  %v1389_v9 = vmul.f32 0.17677669, %v1158_v19 }
 0x2d1   : > { %2633 = vst [vmem:[%s3867_s13 + $0x60] sm:$0xff] %v2575_v62   ;;  %v1164_v38 = vadd.f32 %v1163_v45, %v3792_v56  ;;  %v2707_v44 = vpop.f32.mrb[44].mxu1 }
 0x2d2   : > { %v1390_v49 = vmul.f32 0.17677669, %v1162_v18  ;;  %v1352_v40 = vpop.f32.mrb[45].mxu1  ;;  %v3959_v27 = vadd.f32 %v2707_v44, %v3853_v32 }
 0x2d3   : > { %v2490_v4 = vpack.c.bf16 %v1164_v38, %v1160_v14  ;;  %v2708_v48 = vpop.f32.mrb[46].mxu1  ;;  %v3973_v63 = vadd.f32 %v1352_v40, %v3853_v32 }
 0x2d4   : > { %v2410_v56 = vpack.c.bf16 %v1390_v49, %v1389_v9  ;;  %v3962_v24 = vadd.f32 %v2708_v48, %v3853_v32  ;;  %v1355_v15 = vpop.f32.mrb[47].mxu1 }
 0x2d5   : > { %2617 = vst [vmem:[%s3804_s16 + $0x58] sm:$0xff] %v2490_v4   ;;  %v3976_v52 = vadd.f32 %v1355_v15, %v3853_v32  ;;  %s3990_s16 = scalar_lea.sflag [#allocation9], %s4130_s19 }
 0x2d6   : > { %2602 = vst [vmem:[%s3810_s20 + $0x58] sm:$0xff] %v2410_v56   ;;  %v2590_v21 = vpack.c.bf16 %v3962_v24, %v3959_v27 }
 0x2d7   : > { %2982 = shalt.err (!%p2979_p9)
}
 0x2d8   : > { %s2983_s30 = scalar_lea.hbm %s3953_s27, 2048  ;;  %s2987_s1 = scalar_lea.hbm %s4104_s6, 4096 }
 0x2d9   : > { %p2984_p1 = scmp.ne.s32.totalorder %s3953_s27, %s2983_s30  ;;  %p2988_p7 = scmp.lt.u32.totalorder %s3953_s27, %s4104_s6 }
 0x2da   : > { %p2989_p13 = scmp.lt.u32.totalorder %s2987_s1, %s2983_s30  ;;  %p2991_p6 = scmp.lt.u32.totalorder %s2983_s30, %s3953_s27 }
 0x2db   : > { %p2985_p2 = pnand %p2984_p1, %p3263_p10 }
 0x2dc   : > { %p2990_p4 = por %p2989_p13, %p2988_p7 }
 0x2dd   : > { %p2986_p3 = pneg %p2985_p2 }
 0x2de   : > { %p2992_p8 = por %p2991_p6, %p2990_p4 }
 0x2e0   : > { %p2993_p12 = pnand %p2992_p8, %p2986_p3 }
 0x2e2   : > { %2996 = shalt.err (!%p2993_p12)
}
 0x2e3   : > { %s3125_s19 = smov 64   ;;  %s3126_s12 = smov 4   ;;  %v2585_v32 = vpack.c.bf16 %v3976_v52, %v3973_v63 }
 0x2e4   : > { %2732 = dma.vmem_to_hbm [thread:$0]  (%p3263_p10), %s3956_s3, 2048, %s3953_s27, %s3990_s16, %s3125_s19, %s3125_s19, %s3126_s12  }
 0x2e5   : > { %s1880_s8 = scalar_lea.sflag [#allocation4], %s3319_s17  ;;  %s2997_s30 = scalar_lea.vmem %s3969_s9, 2048 }
 0x2e6   : > { %p2998_p11 = scmp.ne.s32.totalorder %s3969_s9, %s2997_s30  ;;  %s3127_s20 = smov [#allocation7]  }
 0x2e7   : > { %s3001_s22 = sshll.u32 %s3127_s20, 4  ;;  %s3002_s22 = int_to_ptr.vmem [resolvable:$false] %s3001_s22 }
 0x2e8   : > { %p2999_p0 = pnand %p2998_p11, %p3263_p10  ;;  %s3003_s1 = scalar_lea.vmem %s3002_s22, 4096 }
 0x2e9   : > { %p3004_p9 = scmp.lt.s32.totalorder %s3969_s9, %s3002_s22  ;;  %p3005_p1 = scmp.lt.s32.totalorder %s3003_s1, %s2997_s30 }
 0x2ea   : > { %p3000_p5 = pneg %p2999_p0 }
 0x2eb   : > { %p3006_p2 = por %p3005_p1, %p3004_p9 }
 0x2ed   : > { %p3007_p3 = pnand %p3006_p2, %p3000_p5 }
 0x2ef   : > { %3010 = shalt.err (!%p3007_p3)
}
 0x2f0   : > { %s3011_s3 = scalar_lea.hbm %s3967_s11, 2048  ;;  %s3015_s2 = scalar_lea.hbm %s4103_s5, 4096 }
 0x2f1   : > { %p3012_p7 = scmp.ne.s32.totalorder %s3967_s11, %s3011_s3  ;;  %p3016_p6 = scmp.lt.u32.totalorder %s3967_s11, %s4103_s5 }
 0x2f2   : > { %p3017_p8 = scmp.lt.u32.totalorder %s3015_s2, %s3011_s3  ;;  %p3019_p11 = scmp.lt.u32.totalorder %s3011_s3, %s3967_s11 }
 0x2f3   : > { %p3013_p13 = pnand %p3012_p7, %p3263_p10 }
 0x2f4   : > { %p3018_p12 = por %p3017_p8, %p3016_p6 }
 0x2f5   : > { %p3014_p4 = pneg %p3013_p13 }
 0x2f6   : > { %p3020_p0 = por %p3019_p11, %p3018_p12 }
 0x2f8   : > { %p3021_p5 = pnand %p3020_p0, %p3014_p4 }
 0x2fa   : > { %3024 = shalt.err (!%p3021_p5)
}
 0x2fb   : > { %2731 = dma.vmem_to_hbm [thread:$0]  (%p3263_p10), %s3969_s9, 2048, %s3967_s11, %s1880_s8, %s3125_s19, %s3125_s19, %s3126_s12  }
 0x2fc   : > { %2636 = vst [vmem:[%s3867_s13 + $0x78] sm:$0xff] %v2590_v21   ;;  %2635 = vst [vmem:[%s3867_s13 + $0x70] sm:$0xff] %v2585_v32   ;;  %s3025_s30 = scalar_lea.vmem %s3983_s14, 2048  ;;  %s3128_s1 = smov [#allocation10]  }
 0x2fd   : > { %p3026_p9 = scmp.ne.s32.totalorder %s3983_s14, %s3025_s30  ;;  %s3029_s3 = sshll.u32 %s3128_s1, 4  ;;  %s3030_s3 = int_to_ptr.vmem [resolvable:$false] %s3029_s3 }
 0x2fe   : > { %s3031_s17 = scalar_lea.vmem %s3030_s3, 4096  ;;  %p3032_p3 = scmp.lt.s32.totalorder %s3983_s14, %s3030_s3 }
 0x2ff   : > { %p3027_p1 = pnand %p3026_p9, %p3263_p10  ;;  %p3033_p7 = scmp.lt.s32.totalorder %s3031_s17, %s3025_s30 }
 0x301   : > { %p3028_p2 = pneg %p3027_p1  ;;  %p3034_p13 = por %p3033_p7, %p3032_p3 }
 0x303   : > { %p3035_p4 = pnand %p3034_p13, %p3028_p2 }
 0x305   : > { %3038 = shalt.err (!%p3035_p4)
}
 0x306   : > { %s3039_s13 = scalar_lea.hbm %s3981_s0, 2048  ;;  %s3043_s8 = scalar_lea.hbm %s4105_s7, 4096 }
 0x307   : > { %p3040_p6 = scmp.ne.s32.totalorder %s3981_s0, %s3039_s13  ;;  %p3044_p11 = scmp.lt.u32.totalorder %s3981_s0, %s4105_s7 }
 0x308   : > { %p3045_p0 = scmp.lt.u32.totalorder %s3043_s8, %s3039_s13  ;;  %p3047_p9 = scmp.lt.u32.totalorder %s3039_s13, %s3981_s0 }
 0x309   : > { %p3041_p8 = pnand %p3040_p6, %p3263_p10 }
 0x30a   : > { %p3046_p5 = por %p3045_p0, %p3044_p11 }
 0x30b   : > { %p3042_p12 = pneg %p3041_p8 }
 0x30c   : > { %p3048_p1 = por %p3047_p9, %p3046_p5 }
 0x30e   : > { %p3049_p2 = pnand %p3048_p1, %p3042_p12 }
 0x310   : > { %3052 = shalt.err (!%p3049_p2)
}
 0x311   : > { %2733 = dma.vmem_to_hbm [thread:$0]  (%p3263_p10), %s3983_s14, 2048, %s3981_s0, %s3990_s16, %s3125_s19, %s3125_s19, %s3126_s12  }
 0x312 PF: > { %s1956_s2 = sand.u32 1, %s3095_s24   ;;  %p4131_p3 = scmp.ne.s32.totalorder %s4115_s10, 0 }
 0x313   : > { %p4132_p7 = scmp.ge.s32.totalorder %s3115_s29, 2  ;;  %s1957_s20 = scalar_lea.sflag [#allocation4], %s1956_s2 }
 0x315   : > { %p2746_p13 = pnand %p4132_p7, %p4131_p3 }
 0x317   : > { %3086 = dma.done.wait (!%p2746_p13), %s1957_s20, 2048  }
 0x318   : > { %3088 = vsyncadd (!%p2746_p13), %s1957_s20, 4294965248  ;;  %s4133_s21 = sadd.s32 4294967294, %s3115_s29  }
 0x319   : > { %s1965_s22 = sand.u32 1, %s4133_s21  }
 0x31a   : > { %s1966_s30 = scalar_lea.sflag [#allocation9], %s1965_s22 }
 0x31b   : > { %3090 = dma.done.wait (!%p2746_p13), %s1966_s30, 4096  }
 0x31c   : > { %3092 = vsyncadd (!%p2746_p13), %s1966_s30, 4294963200  ;;  %s28_s29 = sadd.s32 1, %s3115_s29   ;;  %s4134_s24 = smov %s3099_s25 }
 0x31d   : > { %p25_p10 = scmp.ge.s32.totalorder %s28_s29, 4   ;;  %s4135_s25 = smov %s3103_s26 }
 0x31e   : > { %s4136_s26 = smov %s3272_s23  ;;  %s4137_s27 = smov %s3111_s28 }
 0x31f   : > { %s4138_s28 = smov %s4140_s15  ;;  %27 = sbr.rel (!%p25_p10) target bundleno = 14 (0xe), region = 121 }
 0x326   :  { %1980 = vsyncpa [#allocation3], 1 }
 0x327   :  { %1982 = vsyncpa [#allocation3 + $0x1], 1 }
 0x328   :  { %1983 = vsyncpa [#allocation6], 1 }
 0x329   :  { %1984 = vsyncpa [#allocation4], 1 }
 0x32a   :  { %1986 = vsyncpa [#allocation4 + $0x1], 1 }
 0x32b   :  { %1987 = vsyncpa [#allocation9], 1 }
 0x32c   :  { %1989 = vsyncpa [#allocation9 + $0x1], 1 }

</bundles_post_ra>
